<compile_context>
chip_gen: v5e
topology: v5e:2x2
jax: 0.10.0
libtpu: 0.0.40
codegen_flags: <defaults>
</compile_context>

<pallas_src>
import functools

import jax
import jax.numpy as jnp
from jax import lax
from jax.experimental import pallas as pl
from jax.experimental.pallas import tpu as pltpu

INV_SCALE_FACTOR = 10.0
DROPOUT_P = 0.75
DROPOUT_SCALE = 1.0 / (1.0 - DROPOUT_P)   # 4.0
_FIELDS_PER_HASH = 16                     # 2 bits per (m, n) score position
_LANES = 128
MAX_TBS = 64                              # sublane tile: 64*128 = 8192 batches/step


def _i32(v):
    """Python int -> value representable as int32 (two's-complement wrap)."""
    return ((int(v) + 2 ** 31) % 2 ** 32) - 2 ** 31


def _derive_seed32(seed):
    return _i32((int(seed) * 0x9E3779B1 + 0x7F4A7C15) & 0xFFFFFFFF)


def _mix32(x):
    """Murmur3-style finalizer on int32.  Wrap-around multiplies; logical right
    shifts emulated with arithmetic shift + mask (int32-only ops lower cleanly
    in Mosaic).  Pure jnp, so host and kernel produce identical bits."""
    x = x ^ ((x >> 16) & jnp.int32(0xFFFF))
    x = x * jnp.int32(_i32(0x85EBCA6B))
    x = x ^ ((x >> 13) & jnp.int32(0x7FFFF))
    x = x * jnp.int32(_i32(0xC2B2AE35))
    x = x ^ ((x >> 16) & jnp.int32(0xFFFF))
    return x


def _hash_groups(batch_idx_i32, seed32, n_groups):
    """One int32 hash per batch element per group of 16 (m,n) positions."""
    out = []
    for g in range(n_groups):
        x = batch_idx_i32 * jnp.int32(n_groups) + jnp.int32(g)
        out.append(_mix32(x ^ jnp.int32(seed32)))
    return out


def _keep_from_hash(h, field):
    """Extract 2 bits -> Bernoulli(keep = 0.25) exactly.  field in [0, 16)."""
    return ((h >> (2 * field)) & jnp.int32(3)) == jnp.int32(0)


def _attn_dropout_kernel(x1_ref, x2_ref, o_ref, *, M, N, K, TBs, seed32):
    # Layouts (batch packed over sublane x lane):
    #   x1_ref: (M, K, TBs, 128)   x2_ref: (N, K, TBs, 128)   o_ref: (M, K, TBs, 128)
    f32 = jnp.float32
    inv_scale = f32(1.0 / INV_SCALE_FACTOR)

    # Global batch index of every element in this tile's (TBs, 128) slab.
    tile_off = pl.program_id(0) * (TBs * _LANES)
    sub = lax.broadcasted_iota(jnp.int32, (TBs, _LANES), 0)
    lane = lax.broadcasted_iota(jnp.int32, (TBs, _LANES), 1)
    b_idx = tile_off + sub * _LANES + lane

    # In-kernel dropout randomness (no HBM mask stream).
    n_groups = -(-(M * N) // _FIELDS_PER_HASH)
    hashes = _hash_groups(b_idx, seed32, n_groups)

    for m in range(M):
        # Fold the 1/inv_scale_factor into x1's row (K slabs, reused N times).
        x1_row = [x1_ref[m, k].astype(f32) * inv_scale for k in range(K)]

        # Scaled scores s[n] = sum_k x1s[m,k,:] * x2[n,k,:]  (dense VPU FMAs).
        s = []
        for n in range(N):
            acc = x1_row[0] * x2_ref[n, 0].astype(f32)
            for k in range(1, K):
                acc = acc + x1_row[k] * x2_ref[n, k].astype(f32)
            s.append(acc)

        # Numerically stable softmax over n; dropout keep-mask folded into the
        # numerators, normalization + 1/(1-p) folded into the (M,K) output.
        mx = s[0]
        for n in range(1, N):
            mx = jnp.maximum(mx, s[n])
        e = [jnp.exp(s[n] - mx) for n in range(N)]
        denom = e[0]
        for n in range(1, N):
            denom = denom + e[n]

        w = []
        for n in range(N):
            p_idx = m * N + n
            g, field = divmod(p_idx, _FIELDS_PER_HASH)
            keep = _keep_from_hash(hashes[g], field).astype(f32)
            w.append(e[n] * keep)

        inv = pl.reciprocal(denom, approx=True) * f32(DROPOUT_SCALE)

        # o[m,k,:] = (sum_n w[n] * x2[n,k,:]) * 4/denom
        for k in range(K):
            acc = w[0] * x2_ref[0, k].astype(f32)
            for n in range(1, N):
                acc = acc + w[n] * x2_ref[n, k].astype(f32)
            o_ref[m, k] = (acc * inv).astype(o_ref.dtype)


def model_forward(x1, x2, seed=0):
    """x1: (B1, B2, M, K), x2: (B1, B2, N, K) -> (B1, B2, M, K)."""
    B1, B2, M, K = x1.shape
    N = x2.shape[2]
    B = B1 * B2
    out_dtype = x1.dtype
    seed32 = _derive_seed32(seed)

    # ---- batch tiling: pack the flattened batch over (sublane, lane) ----
    Bs_needed = pl.cdiv(B, _LANES)
    if Bs_needed <= 8:
        TBs = Bs_needed  # single tile; block dim == full dim satisfies tiling
    else:
        # multiple of 8 sublanes; aim for >=4 grid steps (v7x megacore +
        # pipeline overlap), cap per-step VMEM (~0.5 MiB/step at TBs=64).
        TBs = min(MAX_TBS, max(8, 8 * pl.cdiv(Bs_needed, 4 * 8)))
    Bs = pl.cdiv(Bs_needed, TBs) * TBs
    Bp = Bs * _LANES

    # ---- layout plumbing only (see TODO at top about avoiding it) ----
    def to_batch_last(x, rows):
        xb = x.reshape(B, rows, K)
        xb = jnp.pad(xb, ((0, Bp - B), (0, 0), (0, 0)))   # zero-pad: softmax stays finite
        xb = jnp.transpose(xb, (1, 2, 0))                 # (rows, K, Bp)
        return xb.reshape(rows, K, Bs, _LANES)

    x1b = to_batch_last(x1, M)
    x2b = to_batch_last(x2, N)

    kernel = functools.partial(_attn_dropout_kernel,
                               M=M, N=N, K=K, TBs=TBs, seed32=seed32)
    out = pl.pallas_call(
        kernel,
        out_shape=jax.ShapeDtypeStruct((M, K, Bs, _LANES), out_dtype),
        grid=(Bs // TBs,),
        in_specs=[
            pl.BlockSpec((M, K, TBs, _LANES), lambda i: (0, 0, i, 0)),
            pl.BlockSpec((N, K, TBs, _LANES), lambda i: (0, 0, i, 0)),
        ],
        out_specs=pl.BlockSpec((M, K, TBs, _LANES), lambda i: (0, 0, i, 0)),
        compiler_params=pltpu.CompilerParams(
            dimension_semantics=("parallel",)),
    )(x1b, x2b)

    out = out.reshape(M, K, Bp)[:, :, :B]   # drop batch padding
    out = jnp.transpose(out, (2, 0, 1))     # (B, M, K)
    return out.reshape(B1, B2, M, K)


def _reference_keep_mask(B, M, N, seed32):
    """Same hash-derived dropout keep mask, computed in pure JAX on host."""
    n_groups = -(-(M * N) // _FIELDS_PER_HASH)
    b = jnp.arange(B, dtype=jnp.int32)
    hashes = _hash_groups(b, seed32, n_groups)          # list of (B,) int32
    rows = []
    for m in range(M):
        cols = []
        for n in range(N):
            g, field = divmod(m * N + n, _FIELDS_PER_HASH)
            cols.append(_keep_from_hash(hashes[g], field).astype(jnp.float32))
        rows.append(jnp.stack(cols, axis=-1))           # (B, N)
    return jnp.stack(rows, axis=1)                      # (B, M, N)


if __name__ == "__main__":
    key = jax.random.PRNGKey(0)
    k1, k2 = jax.random.split(key)
    # Shapes from the PyTorch module's example inputs.
    x1 = jax.random.normal(k1, (4, 2, 3, 3), dtype=jnp.float32)
    x2 = jax.random.normal(k2, (4, 2, 5, 3), dtype=jnp.float32)

    y = model_forward(x1, x2, seed=0)
    jax.block_until_ready(y)
    assert y.shape == (4, 2, 3, 3)

    # Pure-JAX reference using the SAME in-kernel hash-derived dropout mask.
    B1, B2, M, K = x1.shape
    N = x2.shape[2]
    B = B1 * B2
    seed32 = _derive_seed32(0)
    keep = _reference_keep_mask(B, M, N, seed32).reshape(B1, B2, M, N)
    v1 = jnp.einsum("abmk,abnk->abmn", x1, x2)
    v3 = jax.nn.softmax(v1 / INV_SCALE_FACTOR, axis=-1)
    ref = jnp.einsum("abmn,abnk->abmk", v3 * keep * DROPOUT_SCALE, x2)

    err = float(jnp.max(jnp.abs(y - ref)))
    # Tolerance covers the approx EUP reciprocal used for the softmax denom.
    assert jnp.allclose(y, ref, rtol=5e-3, atol=1e-4), f"mismatch, max abs err={err}"

    print("KERNEL_OK")
</pallas_src>

<mosaic_0001>
module attributes {stable_mosaic.version = 11 : i64} {
  func.func @_attn_dropout_kernel(%arg0: i32, %arg1: memref<3x3x1x128xf32, #tpu.memory_space<vmem>>, %arg2: memref<5x3x1x128xf32, #tpu.memory_space<vmem>>, %arg3: memref<3x3x1x128xf32, #tpu.memory_space<vmem>>) attributes {dimension_semantics = [#tpu.dimension_semantics<parallel>], iteration_bounds = array<i64: 1>, scalar_prefetch = 0 : i64, scratch_operands = 0 : i64, tpu.core_type = #tpu.core_type<tc>, window_params = [{transform_indices = @transform_0, window_bounds = array<i64: 3, 3, 1, 128>}, {transform_indices = @transform_1, window_bounds = array<i64: 5, 3, 1, 128>}, {transform_indices = @transform_2, window_bounds = array<i64: 3, 3, 1, 128>}]} {
    %c128_i32 = arith.constant 128 : i32
    %0 = arith.muli %arg0, %c128_i32 : i32
    %1 = tpu.iota {dimensions = array<i32: 0>} : vector<1x128xi32>
    %2 = tpu.iota {dimensions = array<i32: 1>} : vector<1x128xi32>
    %c128_i32_0 = arith.constant 128 : i32
    %3 = vector.broadcast %c128_i32_0 : i32 to vector<1x128xi32>
    %4 = arith.muli %1, %3 : vector<1x128xi32>
    %5 = vector.broadcast %0 : i32 to vector<1x128xi32>
    %6 = arith.addi %5, %4 : vector<1x128xi32>
    %7 = arith.addi %6, %2 : vector<1x128xi32>
    %c1_i32 = arith.constant 1 : i32
    %8 = vector.broadcast %c1_i32 : i32 to vector<1x128xi32>
    %9 = arith.muli %7, %8 : vector<1x128xi32>
    %c0_i32 = arith.constant 0 : i32
    %10 = vector.broadcast %c0_i32 : i32 to vector<1x128xi32>
    %11 = arith.addi %9, %10 : vector<1x128xi32>
    %c2135587861_i32 = arith.constant 2135587861 : i32
    %12 = vector.broadcast %c2135587861_i32 : i32 to vector<1x128xi32>
    %13 = arith.xori %11, %12 : vector<1x128xi32>
    %c16_i32 = arith.constant 16 : i32
    %14 = vector.broadcast %c16_i32 : i32 to vector<1x128xi32>
    %15 = arith.shrsi %13, %14 : vector<1x128xi32>
    %c65535_i32 = arith.constant 65535 : i32
    %16 = vector.broadcast %c65535_i32 : i32 to vector<1x128xi32>
    %17 = arith.andi %15, %16 : vector<1x128xi32>
    %18 = arith.xori %13, %17 : vector<1x128xi32>
    %c-2048144789_i32 = arith.constant -2048144789 : i32
    %19 = vector.broadcast %c-2048144789_i32 : i32 to vector<1x128xi32>
    %20 = arith.muli %18, %19 : vector<1x128xi32>
    %c13_i32 = arith.constant 13 : i32
    %21 = vector.broadcast %c13_i32 : i32 to vector<1x128xi32>
    %22 = arith.shrsi %20, %21 : vector<1x128xi32>
    %c524287_i32 = arith.constant 524287 : i32
    %23 = vector.broadcast %c524287_i32 : i32 to vector<1x128xi32>
    %24 = arith.andi %22, %23 : vector<1x128xi32>
    %25 = arith.xori %20, %24 : vector<1x128xi32>
    %c-1028477387_i32 = arith.constant -1028477387 : i32
    %26 = vector.broadcast %c-1028477387_i32 : i32 to vector<1x128xi32>
    %27 = arith.muli %25, %26 : vector<1x128xi32>
    %c16_i32_1 = arith.constant 16 : i32
    %28 = vector.broadcast %c16_i32_1 : i32 to vector<1x128xi32>
    %29 = arith.shrsi %27, %28 : vector<1x128xi32>
    %c65535_i32_2 = arith.constant 65535 : i32
    %30 = vector.broadcast %c65535_i32_2 : i32 to vector<1x128xi32>
    %31 = arith.andi %29, %30 : vector<1x128xi32>
    %32 = arith.xori %27, %31 : vector<1x128xi32>
    %c0 = arith.constant 0 : index
    %c0_3 = arith.constant 0 : index
    %c0_4 = arith.constant 0 : index
    %c0_5 = arith.constant 0 : index
    %33 = vector.load %arg1[%c0, %c0_3, %c0_4, %c0_5] : memref<3x3x1x128xf32, #tpu.memory_space<vmem>>, vector<1x1x1x128xf32>
    %34 = vector.shape_cast %33 : vector<1x1x1x128xf32> to vector<1x128xf32>
    %cst = arith.constant 1.000000e-01 : f32
    %35 = vector.broadcast %cst : f32 to vector<1x128xf32>
    %36 = arith.mulf %34, %35 : vector<1x128xf32>
    %c0_6 = arith.constant 0 : index
    %c1 = arith.constant 1 : index
    %c0_7 = arith.constant 0 : index
    %c0_8 = arith.constant 0 : index
    %37 = vector.load %arg1[%c0_6, %c1, %c0_7, %c0_8] : memref<3x3x1x128xf32, #tpu.memory_space<vmem>>, vector<1x1x1x128xf32>
    %38 = vector.shape_cast %37 : vector<1x1x1x128xf32> to vector<1x128xf32>
    %cst_9 = arith.constant 1.000000e-01 : f32
    %39 = vector.broadcast %cst_9 : f32 to vector<1x128xf32>
    %40 = arith.mulf %38, %39 : vector<1x128xf32>
    %c0_10 = arith.constant 0 : index
    %c2 = arith.constant 2 : index
    %c0_11 = arith.constant 0 : index
    %c0_12 = arith.constant 0 : index
    %41 = vector.load %arg1[%c0_10, %c2, %c0_11, %c0_12] : memref<3x3x1x128xf32, #tpu.memory_space<vmem>>, vector<1x1x1x128xf32>
    %42 = vector.shape_cast %41 : vector<1x1x1x128xf32> to vector<1x128xf32>
    %cst_13 = arith.constant 1.000000e-01 : f32
    %43 = vector.broadcast %cst_13 : f32 to vector<1x128xf32>
    %44 = arith.mulf %42, %43 : vector<1x128xf32>
    %c0_14 = arith.constant 0 : index
    %c0_15 = arith.constant 0 : index
    %c0_16 = arith.constant 0 : index
    %c0_17 = arith.constant 0 : index
    %45 = vector.load %arg2[%c0_14, %c0_15, %c0_16, %c0_17] : memref<5x3x1x128xf32, #tpu.memory_space<vmem>>, vector<1x1x1x128xf32>
    %46 = vector.shape_cast %45 : vector<1x1x1x128xf32> to vector<1x128xf32>
    %47 = arith.mulf %36, %46 : vector<1x128xf32>
    %c0_18 = arith.constant 0 : index
    %c1_19 = arith.constant 1 : index
    %c0_20 = arith.constant 0 : index
    %c0_21 = arith.constant 0 : index
    %48 = vector.load %arg2[%c0_18, %c1_19, %c0_20, %c0_21] : memref<5x3x1x128xf32, #tpu.memory_space<vmem>>, vector<1x1x1x128xf32>
    %49 = vector.shape_cast %48 : vector<1x1x1x128xf32> to vector<1x128xf32>
    %50 = arith.mulf %40, %49 : vector<1x128xf32>
    %51 = arith.addf %47, %50 : vector<1x128xf32>
    %c0_22 = arith.constant 0 : index
    %c2_23 = arith.constant 2 : index
    %c0_24 = arith.constant 0 : index
    %c0_25 = arith.constant 0 : index
    %52 = vector.load %arg2[%c0_22, %c2_23, %c0_24, %c0_25] : memref<5x3x1x128xf32, #tpu.memory_space<vmem>>, vector<1x1x1x128xf32>
    %53 = vector.shape_cast %52 : vector<1x1x1x128xf32> to vector<1x128xf32>
    %54 = arith.mulf %44, %53 : vector<1x128xf32>
    %55 = arith.addf %51, %54 : vector<1x128xf32>
    %c1_26 = arith.constant 1 : index
    %c0_27 = arith.constant 0 : index
    %c0_28 = arith.constant 0 : index
    %c0_29 = arith.constant 0 : index
    %56 = vector.load %arg2[%c1_26, %c0_27, %c0_28, %c0_29] : memref<5x3x1x128xf32, #tpu.memory_space<vmem>>, vector<1x1x1x128xf32>
    %57 = vector.shape_cast %56 : vector<1x1x1x128xf32> to vector<1x128xf32>
    %58 = arith.mulf %36, %57 : vector<1x128xf32>
    %c1_30 = arith.constant 1 : index
    %c1_31 = arith.constant 1 : index
    %c0_32 = arith.constant 0 : index
    %c0_33 = arith.constant 0 : index
    %59 = vector.load %arg2[%c1_30, %c1_31, %c0_32, %c0_33] : memref<5x3x1x128xf32, #tpu.memory_space<vmem>>, vector<1x1x1x128xf32>
    %60 = vector.shape_cast %59 : vector<1x1x1x128xf32> to vector<1x128xf32>
    %61 = arith.mulf %40, %60 : vector<1x128xf32>
    %62 = arith.addf %58, %61 : vector<1x128xf32>
    %c1_34 = arith.constant 1 : index
    %c2_35 = arith.constant 2 : index
    %c0_36 = arith.constant 0 : index
    %c0_37 = arith.constant 0 : index
    %63 = vector.load %arg2[%c1_34, %c2_35, %c0_36, %c0_37] : memref<5x3x1x128xf32, #tpu.memory_space<vmem>>, vector<1x1x1x128xf32>
    %64 = vector.shape_cast %63 : vector<1x1x1x128xf32> to vector<1x128xf32>
    %65 = arith.mulf %44, %64 : vector<1x128xf32>
    %66 = arith.addf %62, %65 : vector<1x128xf32>
    %c2_38 = arith.constant 2 : index
    %c0_39 = arith.constant 0 : index
    %c0_40 = arith.constant 0 : index
    %c0_41 = arith.constant 0 : index
    %67 = vector.load %arg2[%c2_38, %c0_39, %c0_40, %c0_41] : memref<5x3x1x128xf32, #tpu.memory_space<vmem>>, vector<1x1x1x128xf32>
    %68 = vector.shape_cast %67 : vector<1x1x1x128xf32> to vector<1x128xf32>
    %69 = arith.mulf %36, %68 : vector<1x128xf32>
    %c2_42 = arith.constant 2 : index
    %c1_43 = arith.constant 1 : index
    %c0_44 = arith.constant 0 : index
    %c0_45 = arith.constant 0 : index
    %70 = vector.load %arg2[%c2_42, %c1_43, %c0_44, %c0_45] : memref<5x3x1x128xf32, #tpu.memory_space<vmem>>, vector<1x1x1x128xf32>
    %71 = vector.shape_cast %70 : vector<1x1x1x128xf32> to vector<1x128xf32>
    %72 = arith.mulf %40, %71 : vector<1x128xf32>
    %73 = arith.addf %69, %72 : vector<1x128xf32>
    %c2_46 = arith.constant 2 : index
    %c2_47 = arith.constant 2 : index
    %c0_48 = arith.constant 0 : index
    %c0_49 = arith.constant 0 : index
    %74 = vector.load %arg2[%c2_46, %c2_47, %c0_48, %c0_49] : memref<5x3x1x128xf32, #tpu.memory_space<vmem>>, vector<1x1x1x128xf32>
    %75 = vector.shape_cast %74 : vector<1x1x1x128xf32> to vector<1x128xf32>
    %76 = arith.mulf %44, %75 : vector<1x128xf32>
    %77 = arith.addf %73, %76 : vector<1x128xf32>
    %c3 = arith.constant 3 : index
    %c0_50 = arith.constant 0 : index
    %c0_51 = arith.constant 0 : index
    %c0_52 = arith.constant 0 : index
    %78 = vector.load %arg2[%c3, %c0_50, %c0_51, %c0_52] : memref<5x3x1x128xf32, #tpu.memory_space<vmem>>, vector<1x1x1x128xf32>
    %79 = vector.shape_cast %78 : vector<1x1x1x128xf32> to vector<1x128xf32>
    %80 = arith.mulf %36, %79 : vector<1x128xf32>
    %c3_53 = arith.constant 3 : index
    %c1_54 = arith.constant 1 : index
    %c0_55 = arith.constant 0 : index
    %c0_56 = arith.constant 0 : index
    %81 = vector.load %arg2[%c3_53, %c1_54, %c0_55, %c0_56] : memref<5x3x1x128xf32, #tpu.memory_space<vmem>>, vector<1x1x1x128xf32>
    %82 = vector.shape_cast %81 : vector<1x1x1x128xf32> to vector<1x128xf32>
    %83 = arith.mulf %40, %82 : vector<1x128xf32>
    %84 = arith.addf %80, %83 : vector<1x128xf32>
    %c3_57 = arith.constant 3 : index
    %c2_58 = arith.constant 2 : index
    %c0_59 = arith.constant 0 : index
    %c0_60 = arith.constant 0 : index
    %85 = vector.load %arg2[%c3_57, %c2_58, %c0_59, %c0_60] : memref<5x3x1x128xf32, #tpu.memory_space<vmem>>, vector<1x1x1x128xf32>
    %86 = vector.shape_cast %85 : vector<1x1x1x128xf32> to vector<1x128xf32>
    %87 = arith.mulf %44, %86 : vector<1x128xf32>
    %88 = arith.addf %84, %87 : vector<1x128xf32>
    %c4 = arith.constant 4 : index
    %c0_61 = arith.constant 0 : index
    %c0_62 = arith.constant 0 : index
    %c0_63 = arith.constant 0 : index
    %89 = vector.load %arg2[%c4, %c0_61, %c0_62, %c0_63] : memref<5x3x1x128xf32, #tpu.memory_space<vmem>>, vector<1x1x1x128xf32>
    %90 = vector.shape_cast %89 : vector<1x1x1x128xf32> to vector<1x128xf32>
    %91 = arith.mulf %36, %90 : vector<1x128xf32>
    %c4_64 = arith.constant 4 : index
    %c1_65 = arith.constant 1 : index
    %c0_66 = arith.constant 0 : index
    %c0_67 = arith.constant 0 : index
    %92 = vector.load %arg2[%c4_64, %c1_65, %c0_66, %c0_67] : memref<5x3x1x128xf32, #tpu.memory_space<vmem>>, vector<1x1x1x128xf32>
    %93 = vector.shape_cast %92 : vector<1x1x1x128xf32> to vector<1x128xf32>
    %94 = arith.mulf %40, %93 : vector<1x128xf32>
    %95 = arith.addf %91, %94 : vector<1x128xf32>
    %c4_68 = arith.constant 4 : index
    %c2_69 = arith.constant 2 : index
    %c0_70 = arith.constant 0 : index
    %c0_71 = arith.constant 0 : index
    %96 = vector.load %arg2[%c4_68, %c2_69, %c0_70, %c0_71] : memref<5x3x1x128xf32, #tpu.memory_space<vmem>>, vector<1x1x1x128xf32>
    %97 = vector.shape_cast %96 : vector<1x1x1x128xf32> to vector<1x128xf32>
    %98 = arith.mulf %44, %97 : vector<1x128xf32>
    %99 = arith.addf %95, %98 : vector<1x128xf32>
    %100 = arith.maximumf %55, %66 : vector<1x128xf32>
    %101 = arith.maximumf %100, %77 : vector<1x128xf32>
    %102 = arith.maximumf %101, %88 : vector<1x128xf32>
    %103 = arith.maximumf %102, %99 : vector<1x128xf32>
    %104 = arith.subf %55, %103 : vector<1x128xf32>
    %105 = math.exp %104 : vector<1x128xf32>
    %106 = arith.subf %66, %103 : vector<1x128xf32>
    %107 = math.exp %106 : vector<1x128xf32>
    %108 = arith.subf %77, %103 : vector<1x128xf32>
    %109 = math.exp %108 : vector<1x128xf32>
    %110 = arith.subf %88, %103 : vector<1x128xf32>
    %111 = math.exp %110 : vector<1x128xf32>
    %112 = arith.subf %99, %103 : vector<1x128xf32>
    %113 = math.exp %112 : vector<1x128xf32>
    %114 = arith.addf %105, %107 : vector<1x128xf32>
    %115 = arith.addf %114, %109 : vector<1x128xf32>
    %116 = arith.addf %115, %111 : vector<1x128xf32>
    %117 = arith.addf %116, %113 : vector<1x128xf32>
    %c0_i32_72 = arith.constant 0 : i32
    %118 = vector.broadcast %c0_i32_72 : i32 to vector<1x128xi32>
    %119 = arith.shrsi %32, %118 : vector<1x128xi32>
    %c3_i32 = arith.constant 3 : i32
    %120 = vector.broadcast %c3_i32 : i32 to vector<1x128xi32>
    %121 = arith.andi %119, %120 : vector<1x128xi32>
    %c0_i32_73 = arith.constant 0 : i32
    %122 = vector.broadcast %c0_i32_73 : i32 to vector<1x128xi32>
    %123 = arith.cmpi eq, %121, %122 : vector<1x128xi32>
    %124 = arith.extui %123 : vector<1x128xi1> to vector<1x128xi32>
    %125 = arith.sitofp %124 : vector<1x128xi32> to vector<1x128xf32>
    %126 = arith.mulf %105, %125 : vector<1x128xf32>
    %c2_i32 = arith.constant 2 : i32
    %127 = vector.broadcast %c2_i32 : i32 to vector<1x128xi32>
    %128 = arith.shrsi %32, %127 : vector<1x128xi32>
    %c3_i32_74 = arith.constant 3 : i32
    %129 = vector.broadcast %c3_i32_74 : i32 to vector<1x128xi32>
    %130 = arith.andi %128, %129 : vector<1x128xi32>
    %c0_i32_75 = arith.constant 0 : i32
    %131 = vector.broadcast %c0_i32_75 : i32 to vector<1x128xi32>
    %132 = arith.cmpi eq, %130, %131 : vector<1x128xi32>
    %133 = arith.extui %132 : vector<1x128xi1> to vector<1x128xi32>
    %134 = arith.sitofp %133 : vector<1x128xi32> to vector<1x128xf32>
    %135 = arith.mulf %107, %134 : vector<1x128xf32>
    %c4_i32 = arith.constant 4 : i32
    %136 = vector.broadcast %c4_i32 : i32 to vector<1x128xi32>
    %137 = arith.shrsi %32, %136 : vector<1x128xi32>
    %c3_i32_76 = arith.constant 3 : i32
    %138 = vector.broadcast %c3_i32_76 : i32 to vector<1x128xi32>
    %139 = arith.andi %137, %138 : vector<1x128xi32>
    %c0_i32_77 = arith.constant 0 : i32
    %140 = vector.broadcast %c0_i32_77 : i32 to vector<1x128xi32>
    %141 = arith.cmpi eq, %139, %140 : vector<1x128xi32>
    %142 = arith.extui %141 : vector<1x128xi1> to vector<1x128xi32>
    %143 = arith.sitofp %142 : vector<1x128xi32> to vector<1x128xf32>
    %144 = arith.mulf %109, %143 : vector<1x128xf32>
    %c6_i32 = arith.constant 6 : i32
    %145 = vector.broadcast %c6_i32 : i32 to vector<1x128xi32>
    %146 = arith.shrsi %32, %145 : vector<1x128xi32>
    %c3_i32_78 = arith.constant 3 : i32
    %147 = vector.broadcast %c3_i32_78 : i32 to vector<1x128xi32>
    %148 = arith.andi %146, %147 : vector<1x128xi32>
    %c0_i32_79 = arith.constant 0 : i32
    %149 = vector.broadcast %c0_i32_79 : i32 to vector<1x128xi32>
    %150 = arith.cmpi eq, %148, %149 : vector<1x128xi32>
    %151 = arith.extui %150 : vector<1x128xi1> to vector<1x128xi32>
    %152 = arith.sitofp %151 : vector<1x128xi32> to vector<1x128xf32>
    %153 = arith.mulf %111, %152 : vector<1x128xf32>
    %c8_i32 = arith.constant 8 : i32
    %154 = vector.broadcast %c8_i32 : i32 to vector<1x128xi32>
    %155 = arith.shrsi %32, %154 : vector<1x128xi32>
    %c3_i32_80 = arith.constant 3 : i32
    %156 = vector.broadcast %c3_i32_80 : i32 to vector<1x128xi32>
    %157 = arith.andi %155, %156 : vector<1x128xi32>
    %c0_i32_81 = arith.constant 0 : i32
    %158 = vector.broadcast %c0_i32_81 : i32 to vector<1x128xi32>
    %159 = arith.cmpi eq, %157, %158 : vector<1x128xi32>
    %160 = arith.extui %159 : vector<1x128xi1> to vector<1x128xi32>
    %161 = arith.sitofp %160 : vector<1x128xi32> to vector<1x128xf32>
    %162 = arith.mulf %113, %161 : vector<1x128xf32>
    %163 = tpu.reciprocal %117 {approx = true} : vector<1x128xf32> -> vector<1x128xf32>
    %cst_82 = arith.constant 4.000000e+00 : f32
    %164 = vector.broadcast %cst_82 : f32 to vector<1x128xf32>
    %165 = arith.mulf %163, %164 : vector<1x128xf32>
    %c0_83 = arith.constant 0 : index
    %c0_84 = arith.constant 0 : index
    %c0_85 = arith.constant 0 : index
    %c0_86 = arith.constant 0 : index
    %166 = vector.load %arg2[%c0_83, %c0_84, %c0_85, %c0_86] : memref<5x3x1x128xf32, #tpu.memory_space<vmem>>, vector<1x1x1x128xf32>
    %167 = vector.shape_cast %166 : vector<1x1x1x128xf32> to vector<1x128xf32>
    %168 = arith.mulf %126, %167 : vector<1x128xf32>
    %c1_87 = arith.constant 1 : index
    %c0_88 = arith.constant 0 : index
    %c0_89 = arith.constant 0 : index
    %c0_90 = arith.constant 0 : index
    %169 = vector.load %arg2[%c1_87, %c0_88, %c0_89, %c0_90] : memref<5x3x1x128xf32, #tpu.memory_space<vmem>>, vector<1x1x1x128xf32>
    %170 = vector.shape_cast %169 : vector<1x1x1x128xf32> to vector<1x128xf32>
    %171 = arith.mulf %135, %170 : vector<1x128xf32>
    %172 = arith.addf %168, %171 : vector<1x128xf32>
    %c2_91 = arith.constant 2 : index
    %c0_92 = arith.constant 0 : index
    %c0_93 = arith.constant 0 : index
    %c0_94 = arith.constant 0 : index
    %173 = vector.load %arg2[%c2_91, %c0_92, %c0_93, %c0_94] : memref<5x3x1x128xf32, #tpu.memory_space<vmem>>, vector<1x1x1x128xf32>
    %174 = vector.shape_cast %173 : vector<1x1x1x128xf32> to vector<1x128xf32>
    %175 = arith.mulf %144, %174 : vector<1x128xf32>
    %176 = arith.addf %172, %175 : vector<1x128xf32>
    %c3_95 = arith.constant 3 : index
    %c0_96 = arith.constant 0 : index
    %c0_97 = arith.constant 0 : index
    %c0_98 = arith.constant 0 : index
    %177 = vector.load %arg2[%c3_95, %c0_96, %c0_97, %c0_98] : memref<5x3x1x128xf32, #tpu.memory_space<vmem>>, vector<1x1x1x128xf32>
    %178 = vector.shape_cast %177 : vector<1x1x1x128xf32> to vector<1x128xf32>
    %179 = arith.mulf %153, %178 : vector<1x128xf32>
    %180 = arith.addf %176, %179 : vector<1x128xf32>
    %c4_99 = arith.constant 4 : index
    %c0_100 = arith.constant 0 : index
    %c0_101 = arith.constant 0 : index
    %c0_102 = arith.constant 0 : index
    %181 = vector.load %arg2[%c4_99, %c0_100, %c0_101, %c0_102] : memref<5x3x1x128xf32, #tpu.memory_space<vmem>>, vector<1x1x1x128xf32>
    %182 = vector.shape_cast %181 : vector<1x1x1x128xf32> to vector<1x128xf32>
    %183 = arith.mulf %162, %182 : vector<1x128xf32>
    %184 = arith.addf %180, %183 : vector<1x128xf32>
    %185 = arith.mulf %184, %165 : vector<1x128xf32>
    %c0_103 = arith.constant 0 : index
    %c0_104 = arith.constant 0 : index
    %c0_105 = arith.constant 0 : index
    %c0_106 = arith.constant 0 : index
    %186 = vector.load %arg3[%c0_103, %c0_104, %c0_105, %c0_106] : memref<3x3x1x128xf32, #tpu.memory_space<vmem>>, vector<1x1x1x128xf32>
    %187 = vector.shape_cast %186 : vector<1x1x1x128xf32> to vector<1x128xf32>
    %188 = vector.shape_cast %185 : vector<1x128xf32> to vector<1x1x1x128xf32>
    tpu.vector_store %arg3[%c0_103, %c0_104, %c0_105, %c0_106], %188 {strides = array<i32>} : memref<3x3x1x128xf32, #tpu.memory_space<vmem>>, vector<1x1x1x128xf32>,
    %c0_107 = arith.constant 0 : index
    %c1_108 = arith.constant 1 : index
    %c0_109 = arith.constant 0 : index
    %c0_110 = arith.constant 0 : index
    %189 = vector.load %arg2[%c0_107, %c1_108, %c0_109, %c0_110] : memref<5x3x1x128xf32, #tpu.memory_space<vmem>>, vector<1x1x1x128xf32>
    %190 = vector.shape_cast %189 : vector<1x1x1x128xf32> to vector<1x128xf32>
    %191 = arith.mulf %126, %190 : vector<1x128xf32>
    %c1_111 = arith.constant 1 : index
    %c1_112 = arith.constant 1 : index
    %c0_113 = arith.constant 0 : index
    %c0_114 = arith.constant 0 : index
    %192 = vector.load %arg2[%c1_111, %c1_112, %c0_113, %c0_114] : memref<5x3x1x128xf32, #tpu.memory_space<vmem>>, vector<1x1x1x128xf32>
    %193 = vector.shape_cast %192 : vector<1x1x1x128xf32> to vector<1x128xf32>
    %194 = arith.mulf %135, %193 : vector<1x128xf32>
    %195 = arith.addf %191, %194 : vector<1x128xf32>
    %c2_115 = arith.constant 2 : index
    %c1_116 = arith.constant 1 : index
    %c0_117 = arith.constant 0 : index
    %c0_118 = arith.constant 0 : index
    %196 = vector.load %arg2[%c2_115, %c1_116, %c0_117, %c0_118] : memref<5x3x1x128xf32, #tpu.memory_space<vmem>>, vector<1x1x1x128xf32>
    %197 = vector.shape_cast %196 : vector<1x1x1x128xf32> to vector<1x128xf32>
    %198 = arith.mulf %144, %197 : vector<1x128xf32>
    %199 = arith.addf %195, %198 : vector<1x128xf32>
    %c3_119 = arith.constant 3 : index
    %c1_120 = arith.constant 1 : index
    %c0_121 = arith.constant 0 : index
    %c0_122 = arith.constant 0 : index
    %200 = vector.load %arg2[%c3_119, %c1_120, %c0_121, %c0_122] : memref<5x3x1x128xf32, #tpu.memory_space<vmem>>, vector<1x1x1x128xf32>
    %201 = vector.shape_cast %200 : vector<1x1x1x128xf32> to vector<1x128xf32>
    %202 = arith.mulf %153, %201 : vector<1x128xf32>
    %203 = arith.addf %199, %202 : vector<1x128xf32>
    %c4_123 = arith.constant 4 : index
    %c1_124 = arith.constant 1 : index
    %c0_125 = arith.constant 0 : index
    %c0_126 = arith.constant 0 : index
    %204 = vector.load %arg2[%c4_123, %c1_124, %c0_125, %c0_126] : memref<5x3x1x128xf32, #tpu.memory_space<vmem>>, vector<1x1x1x128xf32>
    %205 = vector.shape_cast %204 : vector<1x1x1x128xf32> to vector<1x128xf32>
    %206 = arith.mulf %162, %205 : vector<1x128xf32>
    %207 = arith.addf %203, %206 : vector<1x128xf32>
    %208 = arith.mulf %207, %165 : vector<1x128xf32>
    %c0_127 = arith.constant 0 : index
    %c1_128 = arith.constant 1 : index
    %c0_129 = arith.constant 0 : index
    %c0_130 = arith.constant 0 : index
    %209 = vector.load %arg3[%c0_127, %c1_128, %c0_129, %c0_130] : memref<3x3x1x128xf32, #tpu.memory_space<vmem>>, vector<1x1x1x128xf32>
    %210 = vector.shape_cast %209 : vector<1x1x1x128xf32> to vector<1x128xf32>
    %211 = vector.shape_cast %208 : vector<1x128xf32> to vector<1x1x1x128xf32>
    tpu.vector_store %arg3[%c0_127, %c1_128, %c0_129, %c0_130], %211 {strides = array<i32>} : memref<3x3x1x128xf32, #tpu.memory_space<vmem>>, vector<1x1x1x128xf32>,
    %c0_131 = arith.constant 0 : index
    %c2_132 = arith.constant 2 : index
    %c0_133 = arith.constant 0 : index
    %c0_134 = arith.constant 0 : index
    %212 = vector.load %arg2[%c0_131, %c2_132, %c0_133, %c0_134] : memref<5x3x1x128xf32, #tpu.memory_space<vmem>>, vector<1x1x1x128xf32>
    %213 = vector.shape_cast %212 : vector<1x1x1x128xf32> to vector<1x128xf32>
    %214 = arith.mulf %126, %213 : vector<1x128xf32>
    %c1_135 = arith.constant 1 : index
    %c2_136 = arith.constant 2 : index
    %c0_137 = arith.constant 0 : index
    %c0_138 = arith.constant 0 : index
    %215 = vector.load %arg2[%c1_135, %c2_136, %c0_137, %c0_138] : memref<5x3x1x128xf32, #tpu.memory_space<vmem>>, vector<1x1x1x128xf32>
    %216 = vector.shape_cast %215 : vector<1x1x1x128xf32> to vector<1x128xf32>
    %217 = arith.mulf %135, %216 : vector<1x128xf32>
    %218 = arith.addf %214, %217 : vector<1x128xf32>
    %c2_139 = arith.constant 2 : index
    %c2_140 = arith.constant 2 : index
    %c0_141 = arith.constant 0 : index
    %c0_142 = arith.constant 0 : index
    %219 = vector.load %arg2[%c2_139, %c2_140, %c0_141, %c0_142] : memref<5x3x1x128xf32, #tpu.memory_space<vmem>>, vector<1x1x1x128xf32>
    %220 = vector.shape_cast %219 : vector<1x1x1x128xf32> to vector<1x128xf32>
    %221 = arith.mulf %144, %220 : vector<1x128xf32>
    %222 = arith.addf %218, %221 : vector<1x128xf32>
    %c3_143 = arith.constant 3 : index
    %c2_144 = arith.constant 2 : index
    %c0_145 = arith.constant 0 : index
    %c0_146 = arith.constant 0 : index
    %223 = vector.load %arg2[%c3_143, %c2_144, %c0_145, %c0_146] : memref<5x3x1x128xf32, #tpu.memory_space<vmem>>, vector<1x1x1x128xf32>
    %224 = vector.shape_cast %223 : vector<1x1x1x128xf32> to vector<1x128xf32>
    %225 = arith.mulf %153, %224 : vector<1x128xf32>
    %226 = arith.addf %222, %225 : vector<1x128xf32>
    %c4_147 = arith.constant 4 : index
    %c2_148 = arith.constant 2 : index
    %c0_149 = arith.constant 0 : index
    %c0_150 = arith.constant 0 : index
    %227 = vector.load %arg2[%c4_147, %c2_148, %c0_149, %c0_150] : memref<5x3x1x128xf32, #tpu.memory_space<vmem>>, vector<1x1x1x128xf32>
    %228 = vector.shape_cast %227 : vector<1x1x1x128xf32> to vector<1x128xf32>
    %229 = arith.mulf %162, %228 : vector<1x128xf32>
    %230 = arith.addf %226, %229 : vector<1x128xf32>
    %231 = arith.mulf %230, %165 : vector<1x128xf32>
    %c0_151 = arith.constant 0 : index
    %c2_152 = arith.constant 2 : index
    %c0_153 = arith.constant 0 : index
    %c0_154 = arith.constant 0 : index
    %232 = vector.load %arg3[%c0_151, %c2_152, %c0_153, %c0_154] : memref<3x3x1x128xf32, #tpu.memory_space<vmem>>, vector<1x1x1x128xf32>
    %233 = vector.shape_cast %232 : vector<1x1x1x128xf32> to vector<1x128xf32>
    %234 = vector.shape_cast %231 : vector<1x128xf32> to vector<1x1x1x128xf32>
    tpu.vector_store %arg3[%c0_151, %c2_152, %c0_153, %c0_154], %234 {strides = array<i32>} : memref<3x3x1x128xf32, #tpu.memory_space<vmem>>, vector<1x1x1x128xf32>,
    %c1_155 = arith.constant 1 : index
    %c0_156 = arith.constant 0 : index
    %c0_157 = arith.constant 0 : index
    %c0_158 = arith.constant 0 : index
    %235 = vector.load %arg1[%c1_155, %c0_156, %c0_157, %c0_158] : memref<3x3x1x128xf32, #tpu.memory_space<vmem>>, vector<1x1x1x128xf32>
    %236 = vector.shape_cast %235 : vector<1x1x1x128xf32> to vector<1x128xf32>
    %cst_159 = arith.constant 1.000000e-01 : f32
    %237 = vector.broadcast %cst_159 : f32 to vector<1x128xf32>
    %238 = arith.mulf %236, %237 : vector<1x128xf32>
    %c1_160 = arith.constant 1 : index
    %c1_161 = arith.constant 1 : index
    %c0_162 = arith.constant 0 : index
    %c0_163 = arith.constant 0 : index
    %239 = vector.load %arg1[%c1_160, %c1_161, %c0_162, %c0_163] : memref<3x3x1x128xf32, #tpu.memory_space<vmem>>, vector<1x1x1x128xf32>
    %240 = vector.shape_cast %239 : vector<1x1x1x128xf32> to vector<1x128xf32>
    %cst_164 = arith.constant 1.000000e-01 : f32
    %241 = vector.broadcast %cst_164 : f32 to vector<1x128xf32>
    %242 = arith.mulf %240, %241 : vector<1x128xf32>
    %c1_165 = arith.constant 1 : index
    %c2_166 = arith.constant 2 : index
    %c0_167 = arith.constant 0 : index
    %c0_168 = arith.constant 0 : index
    %243 = vector.load %arg1[%c1_165, %c2_166, %c0_167, %c0_168] : memref<3x3x1x128xf32, #tpu.memory_space<vmem>>, vector<1x1x1x128xf32>
    %244 = vector.shape_cast %243 : vector<1x1x1x128xf32> to vector<1x128xf32>
    %cst_169 = arith.constant 1.000000e-01 : f32
    %245 = vector.broadcast %cst_169 : f32 to vector<1x128xf32>
    %246 = arith.mulf %244, %245 : vector<1x128xf32>
    %c0_170 = arith.constant 0 : index
    %c0_171 = arith.constant 0 : index
    %c0_172 = arith.constant 0 : index
    %c0_173 = arith.constant 0 : index
    %247 = vector.load %arg2[%c0_170, %c0_171, %c0_172, %c0_173] : memref<5x3x1x128xf32, #tpu.memory_space<vmem>>, vector<1x1x1x128xf32>
    %248 = vector.shape_cast %247 : vector<1x1x1x128xf32> to vector<1x128xf32>
    %249 = arith.mulf %238, %248 : vector<1x128xf32>
    %c0_174 = arith.constant 0 : index
    %c1_175 = arith.constant 1 : index
    %c0_176 = arith.constant 0 : index
    %c0_177 = arith.constant 0 : index
    %250 = vector.load %arg2[%c0_174, %c1_175, %c0_176, %c0_177] : memref<5x3x1x128xf32, #tpu.memory_space<vmem>>, vector<1x1x1x128xf32>
    %251 = vector.shape_cast %250 : vector<1x1x1x128xf32> to vector<1x128xf32>
    %252 = arith.mulf %242, %251 : vector<1x128xf32>
    %253 = arith.addf %249, %252 : vector<1x128xf32>
    %c0_178 = arith.constant 0 : index
    %c2_179 = arith.constant 2 : index
    %c0_180 = arith.constant 0 : index
    %c0_181 = arith.constant 0 : index
    %254 = vector.load %arg2[%c0_178, %c2_179, %c0_180, %c0_181] : memref<5x3x1x128xf32, #tpu.memory_space<vmem>>, vector<1x1x1x128xf32>
    %255 = vector.shape_cast %254 : vector<1x1x1x128xf32> to vector<1x128xf32>
    %256 = arith.mulf %246, %255 : vector<1x128xf32>
    %257 = arith.addf %253, %256 : vector<1x128xf32>
    %c1_182 = arith.constant 1 : index
    %c0_183 = arith.constant 0 : index
    %c0_184 = arith.constant 0 : index
    %c0_185 = arith.constant 0 : index
    %258 = vector.load %arg2[%c1_182, %c0_183, %c0_184, %c0_185] : memref<5x3x1x128xf32, #tpu.memory_space<vmem>>, vector<1x1x1x128xf32>
    %259 = vector.shape_cast %258 : vector<1x1x1x128xf32> to vector<1x128xf32>
    %260 = arith.mulf %238, %259 : vector<1x128xf32>
    %c1_186 = arith.constant 1 : index
    %c1_187 = arith.constant 1 : index
    %c0_188 = arith.constant 0 : index
    %c0_189 = arith.constant 0 : index
    %261 = vector.load %arg2[%c1_186, %c1_187, %c0_188, %c0_189] : memref<5x3x1x128xf32, #tpu.memory_space<vmem>>, vector<1x1x1x128xf32>
    %262 = vector.shape_cast %261 : vector<1x1x1x128xf32> to vector<1x128xf32>
    %263 = arith.mulf %242, %262 : vector<1x128xf32>
    %264 = arith.addf %260, %263 : vector<1x128xf32>
    %c1_190 = arith.constant 1 : index
    %c2_191 = arith.constant 2 : index
    %c0_192 = arith.constant 0 : index
    %c0_193 = arith.constant 0 : index
    %265 = vector.load %arg2[%c1_190, %c2_191, %c0_192, %c0_193] : memref<5x3x1x128xf32, #tpu.memory_space<vmem>>, vector<1x1x1x128xf32>
    %266 = vector.shape_cast %265 : vector<1x1x1x128xf32> to vector<1x128xf32>
    %267 = arith.mulf %246, %266 : vector<1x128xf32>
    %268 = arith.addf %264, %267 : vector<1x128xf32>
    %c2_194 = arith.constant 2 : index
    %c0_195 = arith.constant 0 : index
    %c0_196 = arith.constant 0 : index
    %c0_197 = arith.constant 0 : index
    %269 = vector.load %arg2[%c2_194, %c0_195, %c0_196, %c0_197] : memref<5x3x1x128xf32, #tpu.memory_space<vmem>>, vector<1x1x1x128xf32>
    %270 = vector.shape_cast %269 : vector<1x1x1x128xf32> to vector<1x128xf32>
    %271 = arith.mulf %238, %270 : vector<1x128xf32>
    %c2_198 = arith.constant 2 : index
    %c1_199 = arith.constant 1 : index
    %c0_200 = arith.constant 0 : index
    %c0_201 = arith.constant 0 : index
    %272 = vector.load %arg2[%c2_198, %c1_199, %c0_200, %c0_201] : memref<5x3x1x128xf32, #tpu.memory_space<vmem>>, vector<1x1x1x128xf32>
    %273 = vector.shape_cast %272 : vector<1x1x1x128xf32> to vector<1x128xf32>
    %274 = arith.mulf %242, %273 : vector<1x128xf32>
    %275 = arith.addf %271, %274 : vector<1x128xf32>
    %c2_202 = arith.constant 2 : index
    %c2_203 = arith.constant 2 : index
    %c0_204 = arith.constant 0 : index
    %c0_205 = arith.constant 0 : index
    %276 = vector.load %arg2[%c2_202, %c2_203, %c0_204, %c0_205] : memref<5x3x1x128xf32, #tpu.memory_space<vmem>>, vector<1x1x1x128xf32>
    %277 = vector.shape_cast %276 : vector<1x1x1x128xf32> to vector<1x128xf32>
    %278 = arith.mulf %246, %277 : vector<1x128xf32>
    %279 = arith.addf %275, %278 : vector<1x128xf32>
    %c3_206 = arith.constant 3 : index
    %c0_207 = arith.constant 0 : index
    %c0_208 = arith.constant 0 : index
    %c0_209 = arith.constant 0 : index
    %280 = vector.load %arg2[%c3_206, %c0_207, %c0_208, %c0_209] : memref<5x3x1x128xf32, #tpu.memory_space<vmem>>, vector<1x1x1x128xf32>
    %281 = vector.shape_cast %280 : vector<1x1x1x128xf32> to vector<1x128xf32>
    %282 = arith.mulf %238, %281 : vector<1x128xf32>
    %c3_210 = arith.constant 3 : index
    %c1_211 = arith.constant 1 : index
    %c0_212 = arith.constant 0 : index
    %c0_213 = arith.constant 0 : index
    %283 = vector.load %arg2[%c3_210, %c1_211, %c0_212, %c0_213] : memref<5x3x1x128xf32, #tpu.memory_space<vmem>>, vector<1x1x1x128xf32>
    %284 = vector.shape_cast %283 : vector<1x1x1x128xf32> to vector<1x128xf32>
    %285 = arith.mulf %242, %284 : vector<1x128xf32>
    %286 = arith.addf %282, %285 : vector<1x128xf32>
    %c3_214 = arith.constant 3 : index
    %c2_215 = arith.constant 2 : index
    %c0_216 = arith.constant 0 : index
    %c0_217 = arith.constant 0 : index
    %287 = vector.load %arg2[%c3_214, %c2_215, %c0_216, %c0_217] : memref<5x3x1x128xf32, #tpu.memory_space<vmem>>, vector<1x1x1x128xf32>
    %288 = vector.shape_cast %287 : vector<1x1x1x128xf32> to vector<1x128xf32>
    %289 = arith.mulf %246, %288 : vector<1x128xf32>
    %290 = arith.addf %286, %289 : vector<1x128xf32>
    %c4_218 = arith.constant 4 : index
    %c0_219 = arith.constant 0 : index
    %c0_220 = arith.constant 0 : index
    %c0_221 = arith.constant 0 : index
    %291 = vector.load %arg2[%c4_218, %c0_219, %c0_220, %c0_221] : memref<5x3x1x128xf32, #tpu.memory_space<vmem>>, vector<1x1x1x128xf32>
    %292 = vector.shape_cast %291 : vector<1x1x1x128xf32> to vector<1x128xf32>
    %293 = arith.mulf %238, %292 : vector<1x128xf32>
    %c4_222 = arith.constant 4 : index
    %c1_223 = arith.constant 1 : index
    %c0_224 = arith.constant 0 : index
    %c0_225 = arith.constant 0 : index
    %294 = vector.load %arg2[%c4_222, %c1_223, %c0_224, %c0_225] : memref<5x3x1x128xf32, #tpu.memory_space<vmem>>, vector<1x1x1x128xf32>
    %295 = vector.shape_cast %294 : vector<1x1x1x128xf32> to vector<1x128xf32>
    %296 = arith.mulf %242, %295 : vector<1x128xf32>
    %297 = arith.addf %293, %296 : vector<1x128xf32>
    %c4_226 = arith.constant 4 : index
    %c2_227 = arith.constant 2 : index
    %c0_228 = arith.constant 0 : index
    %c0_229 = arith.constant 0 : index
    %298 = vector.load %arg2[%c4_226, %c2_227, %c0_228, %c0_229] : memref<5x3x1x128xf32, #tpu.memory_space<vmem>>, vector<1x1x1x128xf32>
    %299 = vector.shape_cast %298 : vector<1x1x1x128xf32> to vector<1x128xf32>
    %300 = arith.mulf %246, %299 : vector<1x128xf32>
    %301 = arith.addf %297, %300 : vector<1x128xf32>
    %302 = arith.maximumf %257, %268 : vector<1x128xf32>
    %303 = arith.maximumf %302, %279 : vector<1x128xf32>
    %304 = arith.maximumf %303, %290 : vector<1x128xf32>
    %305 = arith.maximumf %304, %301 : vector<1x128xf32>
    %306 = arith.subf %257, %305 : vector<1x128xf32>
    %307 = math.exp %306 : vector<1x128xf32>
    %308 = arith.subf %268, %305 : vector<1x128xf32>
    %309 = math.exp %308 : vector<1x128xf32>
    %310 = arith.subf %279, %305 : vector<1x128xf32>
    %311 = math.exp %310 : vector<1x128xf32>
    %312 = arith.subf %290, %305 : vector<1x128xf32>
    %313 = math.exp %312 : vector<1x128xf32>
    %314 = arith.subf %301, %305 : vector<1x128xf32>
    %315 = math.exp %314 : vector<1x128xf32>
    %316 = arith.addf %307, %309 : vector<1x128xf32>
    %317 = arith.addf %316, %311 : vector<1x128xf32>
    %318 = arith.addf %317, %313 : vector<1x128xf32>
    %319 = arith.addf %318, %315 : vector<1x128xf32>
    %c10_i32 = arith.constant 10 : i32
    %320 = vector.broadcast %c10_i32 : i32 to vector<1x128xi32>
    %321 = arith.shrsi %32, %320 : vector<1x128xi32>
    %c3_i32_230 = arith.constant 3 : i32
    %322 = vector.broadcast %c3_i32_230 : i32 to vector<1x128xi32>
    %323 = arith.andi %321, %322 : vector<1x128xi32>
    %c0_i32_231 = arith.constant 0 : i32
    %324 = vector.broadcast %c0_i32_231 : i32 to vector<1x128xi32>
    %325 = arith.cmpi eq, %323, %324 : vector<1x128xi32>
    %326 = arith.extui %325 : vector<1x128xi1> to vector<1x128xi32>
    %327 = arith.sitofp %326 : vector<1x128xi32> to vector<1x128xf32>
    %328 = arith.mulf %307, %327 : vector<1x128xf32>
    %c12_i32 = arith.constant 12 : i32
    %329 = vector.broadcast %c12_i32 : i32 to vector<1x128xi32>
    %330 = arith.shrsi %32, %329 : vector<1x128xi32>
    %c3_i32_232 = arith.constant 3 : i32
    %331 = vector.broadcast %c3_i32_232 : i32 to vector<1x128xi32>
    %332 = arith.andi %330, %331 : vector<1x128xi32>
    %c0_i32_233 = arith.constant 0 : i32
    %333 = vector.broadcast %c0_i32_233 : i32 to vector<1x128xi32>
    %334 = arith.cmpi eq, %332, %333 : vector<1x128xi32>
    %335 = arith.extui %334 : vector<1x128xi1> to vector<1x128xi32>
    %336 = arith.sitofp %335 : vector<1x128xi32> to vector<1x128xf32>
    %337 = arith.mulf %309, %336 : vector<1x128xf32>
    %c14_i32 = arith.constant 14 : i32
    %338 = vector.broadcast %c14_i32 : i32 to vector<1x128xi32>
    %339 = arith.shrsi %32, %338 : vector<1x128xi32>
    %c3_i32_234 = arith.constant 3 : i32
    %340 = vector.broadcast %c3_i32_234 : i32 to vector<1x128xi32>
    %341 = arith.andi %339, %340 : vector<1x128xi32>
    %c0_i32_235 = arith.constant 0 : i32
    %342 = vector.broadcast %c0_i32_235 : i32 to vector<1x128xi32>
    %343 = arith.cmpi eq, %341, %342 : vector<1x128xi32>
    %344 = arith.extui %343 : vector<1x128xi1> to vector<1x128xi32>
    %345 = arith.sitofp %344 : vector<1x128xi32> to vector<1x128xf32>
    %346 = arith.mulf %311, %345 : vector<1x128xf32>
    %c16_i32_236 = arith.constant 16 : i32
    %347 = vector.broadcast %c16_i32_236 : i32 to vector<1x128xi32>
    %348 = arith.shrsi %32, %347 : vector<1x128xi32>
    %c3_i32_237 = arith.constant 3 : i32
    %349 = vector.broadcast %c3_i32_237 : i32 to vector<1x128xi32>
    %350 = arith.andi %348, %349 : vector<1x128xi32>
    %c0_i32_238 = arith.constant 0 : i32
    %351 = vector.broadcast %c0_i32_238 : i32 to vector<1x128xi32>
    %352 = arith.cmpi eq, %350, %351 : vector<1x128xi32>
    %353 = arith.extui %352 : vector<1x128xi1> to vector<1x128xi32>
    %354 = arith.sitofp %353 : vector<1x128xi32> to vector<1x128xf32>
    %355 = arith.mulf %313, %354 : vector<1x128xf32>
    %c18_i32 = arith.constant 18 : i32
    %356 = vector.broadcast %c18_i32 : i32 to vector<1x128xi32>
    %357 = arith.shrsi %32, %356 : vector<1x128xi32>
    %c3_i32_239 = arith.constant 3 : i32
    %358 = vector.broadcast %c3_i32_239 : i32 to vector<1x128xi32>
    %359 = arith.andi %357, %358 : vector<1x128xi32>
    %c0_i32_240 = arith.constant 0 : i32
    %360 = vector.broadcast %c0_i32_240 : i32 to vector<1x128xi32>
    %361 = arith.cmpi eq, %359, %360 : vector<1x128xi32>
    %362 = arith.extui %361 : vector<1x128xi1> to vector<1x128xi32>
    %363 = arith.sitofp %362 : vector<1x128xi32> to vector<1x128xf32>
    %364 = arith.mulf %315, %363 : vector<1x128xf32>
    %365 = tpu.reciprocal %319 {approx = true} : vector<1x128xf32> -> vector<1x128xf32>
    %cst_241 = arith.constant 4.000000e+00 : f32
    %366 = vector.broadcast %cst_241 : f32 to vector<1x128xf32>
    %367 = arith.mulf %365, %366 : vector<1x128xf32>
    %c0_242 = arith.constant 0 : index
    %c0_243 = arith.constant 0 : index
    %c0_244 = arith.constant 0 : index
    %c0_245 = arith.constant 0 : index
    %368 = vector.load %arg2[%c0_242, %c0_243, %c0_244, %c0_245] : memref<5x3x1x128xf32, #tpu.memory_space<vmem>>, vector<1x1x1x128xf32>
    %369 = vector.shape_cast %368 : vector<1x1x1x128xf32> to vector<1x128xf32>
    %370 = arith.mulf %328, %369 : vector<1x128xf32>
    %c1_246 = arith.constant 1 : index
    %c0_247 = arith.constant 0 : index
    %c0_248 = arith.constant 0 : index
    %c0_249 = arith.constant 0 : index
    %371 = vector.load %arg2[%c1_246, %c0_247, %c0_248, %c0_249] : memref<5x3x1x128xf32, #tpu.memory_space<vmem>>, vector<1x1x1x128xf32>
    %372 = vector.shape_cast %371 : vector<1x1x1x128xf32> to vector<1x128xf32>
    %373 = arith.mulf %337, %372 : vector<1x128xf32>
    %374 = arith.addf %370, %373 : vector<1x128xf32>
    %c2_250 = arith.constant 2 : index
    %c0_251 = arith.constant 0 : index
    %c0_252 = arith.constant 0 : index
    %c0_253 = arith.constant 0 : index
    %375 = vector.load %arg2[%c2_250, %c0_251, %c0_252, %c0_253] : memref<5x3x1x128xf32, #tpu.memory_space<vmem>>, vector<1x1x1x128xf32>
    %376 = vector.shape_cast %375 : vector<1x1x1x128xf32> to vector<1x128xf32>
    %377 = arith.mulf %346, %376 : vector<1x128xf32>
    %378 = arith.addf %374, %377 : vector<1x128xf32>
    %c3_254 = arith.constant 3 : index
    %c0_255 = arith.constant 0 : index
    %c0_256 = arith.constant 0 : index
    %c0_257 = arith.constant 0 : index
    %379 = vector.load %arg2[%c3_254, %c0_255, %c0_256, %c0_257] : memref<5x3x1x128xf32, #tpu.memory_space<vmem>>, vector<1x1x1x128xf32>
    %380 = vector.shape_cast %379 : vector<1x1x1x128xf32> to vector<1x128xf32>
    %381 = arith.mulf %355, %380 : vector<1x128xf32>
    %382 = arith.addf %378, %381 : vector<1x128xf32>
    %c4_258 = arith.constant 4 : index
    %c0_259 = arith.constant 0 : index
    %c0_260 = arith.constant 0 : index
    %c0_261 = arith.constant 0 : index
    %383 = vector.load %arg2[%c4_258, %c0_259, %c0_260, %c0_261] : memref<5x3x1x128xf32, #tpu.memory_space<vmem>>, vector<1x1x1x128xf32>
    %384 = vector.shape_cast %383 : vector<1x1x1x128xf32> to vector<1x128xf32>
    %385 = arith.mulf %364, %384 : vector<1x128xf32>
    %386 = arith.addf %382, %385 : vector<1x128xf32>
    %387 = arith.mulf %386, %367 : vector<1x128xf32>
    %c1_262 = arith.constant 1 : index
    %c0_263 = arith.constant 0 : index
    %c0_264 = arith.constant 0 : index
    %c0_265 = arith.constant 0 : index
    %388 = vector.load %arg3[%c1_262, %c0_263, %c0_264, %c0_265] : memref<3x3x1x128xf32, #tpu.memory_space<vmem>>, vector<1x1x1x128xf32>
    %389 = vector.shape_cast %388 : vector<1x1x1x128xf32> to vector<1x128xf32>
    %390 = vector.shape_cast %387 : vector<1x128xf32> to vector<1x1x1x128xf32>
    tpu.vector_store %arg3[%c1_262, %c0_263, %c0_264, %c0_265], %390 {strides = array<i32>} : memref<3x3x1x128xf32, #tpu.memory_space<vmem>>, vector<1x1x1x128xf32>,
    %c0_266 = arith.constant 0 : index
    %c1_267 = arith.constant 1 : index
    %c0_268 = arith.constant 0 : index
    %c0_269 = arith.constant 0 : index
    %391 = vector.load %arg2[%c0_266, %c1_267, %c0_268, %c0_269] : memref<5x3x1x128xf32, #tpu.memory_space<vmem>>, vector<1x1x1x128xf32>
    %392 = vector.shape_cast %391 : vector<1x1x1x128xf32> to vector<1x128xf32>
    %393 = arith.mulf %328, %392 : vector<1x128xf32>
    %c1_270 = arith.constant 1 : index
    %c1_271 = arith.constant 1 : index
    %c0_272 = arith.constant 0 : index
    %c0_273 = arith.constant 0 : index
    %394 = vector.load %arg2[%c1_270, %c1_271, %c0_272, %c0_273] : memref<5x3x1x128xf32, #tpu.memory_space<vmem>>, vector<1x1x1x128xf32>
    %395 = vector.shape_cast %394 : vector<1x1x1x128xf32> to vector<1x128xf32>
    %396 = arith.mulf %337, %395 : vector<1x128xf32>
    %397 = arith.addf %393, %396 : vector<1x128xf32>
    %c2_274 = arith.constant 2 : index
    %c1_275 = arith.constant 1 : index
    %c0_276 = arith.constant 0 : index
    %c0_277 = arith.constant 0 : index
    %398 = vector.load %arg2[%c2_274, %c1_275, %c0_276, %c0_277] : memref<5x3x1x128xf32, #tpu.memory_space<vmem>>, vector<1x1x1x128xf32>
    %399 = vector.shape_cast %398 : vector<1x1x1x128xf32> to vector<1x128xf32>
    %400 = arith.mulf %346, %399 : vector<1x128xf32>
    %401 = arith.addf %397, %400 : vector<1x128xf32>
    %c3_278 = arith.constant 3 : index
    %c1_279 = arith.constant 1 : index
    %c0_280 = arith.constant 0 : index
    %c0_281 = arith.constant 0 : index
    %402 = vector.load %arg2[%c3_278, %c1_279, %c0_280, %c0_281] : memref<5x3x1x128xf32, #tpu.memory_space<vmem>>, vector<1x1x1x128xf32>
    %403 = vector.shape_cast %402 : vector<1x1x1x128xf32> to vector<1x128xf32>
    %404 = arith.mulf %355, %403 : vector<1x128xf32>
    %405 = arith.addf %401, %404 : vector<1x128xf32>
    %c4_282 = arith.constant 4 : index
    %c1_283 = arith.constant 1 : index
    %c0_284 = arith.constant 0 : index
    %c0_285 = arith.constant 0 : index
    %406 = vector.load %arg2[%c4_282, %c1_283, %c0_284, %c0_285] : memref<5x3x1x128xf32, #tpu.memory_space<vmem>>, vector<1x1x1x128xf32>
    %407 = vector.shape_cast %406 : vector<1x1x1x128xf32> to vector<1x128xf32>
    %408 = arith.mulf %364, %407 : vector<1x128xf32>
    %409 = arith.addf %405, %408 : vector<1x128xf32>
    %410 = arith.mulf %409, %367 : vector<1x128xf32>
    %c1_286 = arith.constant 1 : index
    %c1_287 = arith.constant 1 : index
    %c0_288 = arith.constant 0 : index
    %c0_289 = arith.constant 0 : index
    %411 = vector.load %arg3[%c1_286, %c1_287, %c0_288, %c0_289] : memref<3x3x1x128xf32, #tpu.memory_space<vmem>>, vector<1x1x1x128xf32>
    %412 = vector.shape_cast %411 : vector<1x1x1x128xf32> to vector<1x128xf32>
    %413 = vector.shape_cast %410 : vector<1x128xf32> to vector<1x1x1x128xf32>
    tpu.vector_store %arg3[%c1_286, %c1_287, %c0_288, %c0_289], %413 {strides = array<i32>} : memref<3x3x1x128xf32, #tpu.memory_space<vmem>>, vector<1x1x1x128xf32>,
    %c0_290 = arith.constant 0 : index
    %c2_291 = arith.constant 2 : index
    %c0_292 = arith.constant 0 : index
    %c0_293 = arith.constant 0 : index
    %414 = vector.load %arg2[%c0_290, %c2_291, %c0_292, %c0_293] : memref<5x3x1x128xf32, #tpu.memory_space<vmem>>, vector<1x1x1x128xf32>
    %415 = vector.shape_cast %414 : vector<1x1x1x128xf32> to vector<1x128xf32>
    %416 = arith.mulf %328, %415 : vector<1x128xf32>
    %c1_294 = arith.constant 1 : index
    %c2_295 = arith.constant 2 : index
    %c0_296 = arith.constant 0 : index
    %c0_297 = arith.constant 0 : index
    %417 = vector.load %arg2[%c1_294, %c2_295, %c0_296, %c0_297] : memref<5x3x1x128xf32, #tpu.memory_space<vmem>>, vector<1x1x1x128xf32>
    %418 = vector.shape_cast %417 : vector<1x1x1x128xf32> to vector<1x128xf32>
    %419 = arith.mulf %337, %418 : vector<1x128xf32>
    %420 = arith.addf %416, %419 : vector<1x128xf32>
    %c2_298 = arith.constant 2 : index
    %c2_299 = arith.constant 2 : index
    %c0_300 = arith.constant 0 : index
    %c0_301 = arith.constant 0 : index
    %421 = vector.load %arg2[%c2_298, %c2_299, %c0_300, %c0_301] : memref<5x3x1x128xf32, #tpu.memory_space<vmem>>, vector<1x1x1x128xf32>
    %422 = vector.shape_cast %421 : vector<1x1x1x128xf32> to vector<1x128xf32>
    %423 = arith.mulf %346, %422 : vector<1x128xf32>
    %424 = arith.addf %420, %423 : vector<1x128xf32>
    %c3_302 = arith.constant 3 : index
    %c2_303 = arith.constant 2 : index
    %c0_304 = arith.constant 0 : index
    %c0_305 = arith.constant 0 : index
    %425 = vector.load %arg2[%c3_302, %c2_303, %c0_304, %c0_305] : memref<5x3x1x128xf32, #tpu.memory_space<vmem>>, vector<1x1x1x128xf32>
    %426 = vector.shape_cast %425 : vector<1x1x1x128xf32> to vector<1x128xf32>
    %427 = arith.mulf %355, %426 : vector<1x128xf32>
    %428 = arith.addf %424, %427 : vector<1x128xf32>
    %c4_306 = arith.constant 4 : index
    %c2_307 = arith.constant 2 : index
    %c0_308 = arith.constant 0 : index
    %c0_309 = arith.constant 0 : index
    %429 = vector.load %arg2[%c4_306, %c2_307, %c0_308, %c0_309] : memref<5x3x1x128xf32, #tpu.memory_space<vmem>>, vector<1x1x1x128xf32>
    %430 = vector.shape_cast %429 : vector<1x1x1x128xf32> to vector<1x128xf32>
    %431 = arith.mulf %364, %430 : vector<1x128xf32>
    %432 = arith.addf %428, %431 : vector<1x128xf32>
    %433 = arith.mulf %432, %367 : vector<1x128xf32>
    %c1_310 = arith.constant 1 : index
    %c2_311 = arith.constant 2 : index
    %c0_312 = arith.constant 0 : index
    %c0_313 = arith.constant 0 : index
    %434 = vector.load %arg3[%c1_310, %c2_311, %c0_312, %c0_313] : memref<3x3x1x128xf32, #tpu.memory_space<vmem>>, vector<1x1x1x128xf32>
    %435 = vector.shape_cast %434 : vector<1x1x1x128xf32> to vector<1x128xf32>
    %436 = vector.shape_cast %433 : vector<1x128xf32> to vector<1x1x1x128xf32>
    tpu.vector_store %arg3[%c1_310, %c2_311, %c0_312, %c0_313], %436 {strides = array<i32>} : memref<3x3x1x128xf32, #tpu.memory_space<vmem>>, vector<1x1x1x128xf32>,
    %c2_314 = arith.constant 2 : index
    %c0_315 = arith.constant 0 : index
    %c0_316 = arith.constant 0 : index
    %c0_317 = arith.constant 0 : index
    %437 = vector.load %arg1[%c2_314, %c0_315, %c0_316, %c0_317] : memref<3x3x1x128xf32, #tpu.memory_space<vmem>>, vector<1x1x1x128xf32>
    %438 = vector.shape_cast %437 : vector<1x1x1x128xf32> to vector<1x128xf32>
    %cst_318 = arith.constant 1.000000e-01 : f32
    %439 = vector.broadcast %cst_318 : f32 to vector<1x128xf32>
    %440 = arith.mulf %438, %439 : vector<1x128xf32>
    %c2_319 = arith.constant 2 : index
    %c1_320 = arith.constant 1 : index
    %c0_321 = arith.constant 0 : index
    %c0_322 = arith.constant 0 : index
    %441 = vector.load %arg1[%c2_319, %c1_320, %c0_321, %c0_322] : memref<3x3x1x128xf32, #tpu.memory_space<vmem>>, vector<1x1x1x128xf32>
    %442 = vector.shape_cast %441 : vector<1x1x1x128xf32> to vector<1x128xf32>
    %cst_323 = arith.constant 1.000000e-01 : f32
    %443 = vector.broadcast %cst_323 : f32 to vector<1x128xf32>
    %444 = arith.mulf %442, %443 : vector<1x128xf32>
    %c2_324 = arith.constant 2 : index
    %c2_325 = arith.constant 2 : index
    %c0_326 = arith.constant 0 : index
    %c0_327 = arith.constant 0 : index
    %445 = vector.load %arg1[%c2_324, %c2_325, %c0_326, %c0_327] : memref<3x3x1x128xf32, #tpu.memory_space<vmem>>, vector<1x1x1x128xf32>
    %446 = vector.shape_cast %445 : vector<1x1x1x128xf32> to vector<1x128xf32>
    %cst_328 = arith.constant 1.000000e-01 : f32
    %447 = vector.broadcast %cst_328 : f32 to vector<1x128xf32>
    %448 = arith.mulf %446, %447 : vector<1x128xf32>
    %c0_329 = arith.constant 0 : index
    %c0_330 = arith.constant 0 : index
    %c0_331 = arith.constant 0 : index
    %c0_332 = arith.constant 0 : index
    %449 = vector.load %arg2[%c0_329, %c0_330, %c0_331, %c0_332] : memref<5x3x1x128xf32, #tpu.memory_space<vmem>>, vector<1x1x1x128xf32>
    %450 = vector.shape_cast %449 : vector<1x1x1x128xf32> to vector<1x128xf32>
    %451 = arith.mulf %440, %450 : vector<1x128xf32>
    %c0_333 = arith.constant 0 : index
    %c1_334 = arith.constant 1 : index
    %c0_335 = arith.constant 0 : index
    %c0_336 = arith.constant 0 : index
    %452 = vector.load %arg2[%c0_333, %c1_334, %c0_335, %c0_336] : memref<5x3x1x128xf32, #tpu.memory_space<vmem>>, vector<1x1x1x128xf32>
    %453 = vector.shape_cast %452 : vector<1x1x1x128xf32> to vector<1x128xf32>
    %454 = arith.mulf %444, %453 : vector<1x128xf32>
    %455 = arith.addf %451, %454 : vector<1x128xf32>
    %c0_337 = arith.constant 0 : index
    %c2_338 = arith.constant 2 : index
    %c0_339 = arith.constant 0 : index
    %c0_340 = arith.constant 0 : index
    %456 = vector.load %arg2[%c0_337, %c2_338, %c0_339, %c0_340] : memref<5x3x1x128xf32, #tpu.memory_space<vmem>>, vector<1x1x1x128xf32>
    %457 = vector.shape_cast %456 : vector<1x1x1x128xf32> to vector<1x128xf32>
    %458 = arith.mulf %448, %457 : vector<1x128xf32>
    %459 = arith.addf %455, %458 : vector<1x128xf32>
    %c1_341 = arith.constant 1 : index
    %c0_342 = arith.constant 0 : index
    %c0_343 = arith.constant 0 : index
    %c0_344 = arith.constant 0 : index
    %460 = vector.load %arg2[%c1_341, %c0_342, %c0_343, %c0_344] : memref<5x3x1x128xf32, #tpu.memory_space<vmem>>, vector<1x1x1x128xf32>
    %461 = vector.shape_cast %460 : vector<1x1x1x128xf32> to vector<1x128xf32>
    %462 = arith.mulf %440, %461 : vector<1x128xf32>
    %c1_345 = arith.constant 1 : index
    %c1_346 = arith.constant 1 : index
    %c0_347 = arith.constant 0 : index
    %c0_348 = arith.constant 0 : index
    %463 = vector.load %arg2[%c1_345, %c1_346, %c0_347, %c0_348] : memref<5x3x1x128xf32, #tpu.memory_space<vmem>>, vector<1x1x1x128xf32>
    %464 = vector.shape_cast %463 : vector<1x1x1x128xf32> to vector<1x128xf32>
    %465 = arith.mulf %444, %464 : vector<1x128xf32>
    %466 = arith.addf %462, %465 : vector<1x128xf32>
    %c1_349 = arith.constant 1 : index
    %c2_350 = arith.constant 2 : index
    %c0_351 = arith.constant 0 : index
    %c0_352 = arith.constant 0 : index
    %467 = vector.load %arg2[%c1_349, %c2_350, %c0_351, %c0_352] : memref<5x3x1x128xf32, #tpu.memory_space<vmem>>, vector<1x1x1x128xf32>
    %468 = vector.shape_cast %467 : vector<1x1x1x128xf32> to vector<1x128xf32>
    %469 = arith.mulf %448, %468 : vector<1x128xf32>
    %470 = arith.addf %466, %469 : vector<1x128xf32>
    %c2_353 = arith.constant 2 : index
    %c0_354 = arith.constant 0 : index
    %c0_355 = arith.constant 0 : index
    %c0_356 = arith.constant 0 : index
    %471 = vector.load %arg2[%c2_353, %c0_354, %c0_355, %c0_356] : memref<5x3x1x128xf32, #tpu.memory_space<vmem>>, vector<1x1x1x128xf32>
    %472 = vector.shape_cast %471 : vector<1x1x1x128xf32> to vector<1x128xf32>
    %473 = arith.mulf %440, %472 : vector<1x128xf32>
    %c2_357 = arith.constant 2 : index
    %c1_358 = arith.constant 1 : index
    %c0_359 = arith.constant 0 : index
    %c0_360 = arith.constant 0 : index
    %474 = vector.load %arg2[%c2_357, %c1_358, %c0_359, %c0_360] : memref<5x3x1x128xf32, #tpu.memory_space<vmem>>, vector<1x1x1x128xf32>
    %475 = vector.shape_cast %474 : vector<1x1x1x128xf32> to vector<1x128xf32>
    %476 = arith.mulf %444, %475 : vector<1x128xf32>
    %477 = arith.addf %473, %476 : vector<1x128xf32>
    %c2_361 = arith.constant 2 : index
    %c2_362 = arith.constant 2 : index
    %c0_363 = arith.constant 0 : index
    %c0_364 = arith.constant 0 : index
    %478 = vector.load %arg2[%c2_361, %c2_362, %c0_363, %c0_364] : memref<5x3x1x128xf32, #tpu.memory_space<vmem>>, vector<1x1x1x128xf32>
    %479 = vector.shape_cast %478 : vector<1x1x1x128xf32> to vector<1x128xf32>
    %480 = arith.mulf %448, %479 : vector<1x128xf32>
    %481 = arith.addf %477, %480 : vector<1x128xf32>
    %c3_365 = arith.constant 3 : index
    %c0_366 = arith.constant 0 : index
    %c0_367 = arith.constant 0 : index
    %c0_368 = arith.constant 0 : index
    %482 = vector.load %arg2[%c3_365, %c0_366, %c0_367, %c0_368] : memref<5x3x1x128xf32, #tpu.memory_space<vmem>>, vector<1x1x1x128xf32>
    %483 = vector.shape_cast %482 : vector<1x1x1x128xf32> to vector<1x128xf32>
    %484 = arith.mulf %440, %483 : vector<1x128xf32>
    %c3_369 = arith.constant 3 : index
    %c1_370 = arith.constant 1 : index
    %c0_371 = arith.constant 0 : index
    %c0_372 = arith.constant 0 : index
    %485 = vector.load %arg2[%c3_369, %c1_370, %c0_371, %c0_372] : memref<5x3x1x128xf32, #tpu.memory_space<vmem>>, vector<1x1x1x128xf32>
    %486 = vector.shape_cast %485 : vector<1x1x1x128xf32> to vector<1x128xf32>
    %487 = arith.mulf %444, %486 : vector<1x128xf32>
    %488 = arith.addf %484, %487 : vector<1x128xf32>
    %c3_373 = arith.constant 3 : index
    %c2_374 = arith.constant 2 : index
    %c0_375 = arith.constant 0 : index
    %c0_376 = arith.constant 0 : index
    %489 = vector.load %arg2[%c3_373, %c2_374, %c0_375, %c0_376] : memref<5x3x1x128xf32, #tpu.memory_space<vmem>>, vector<1x1x1x128xf32>
    %490 = vector.shape_cast %489 : vector<1x1x1x128xf32> to vector<1x128xf32>
    %491 = arith.mulf %448, %490 : vector<1x128xf32>
    %492 = arith.addf %488, %491 : vector<1x128xf32>
    %c4_377 = arith.constant 4 : index
    %c0_378 = arith.constant 0 : index
    %c0_379 = arith.constant 0 : index
    %c0_380 = arith.constant 0 : index
    %493 = vector.load %arg2[%c4_377, %c0_378, %c0_379, %c0_380] : memref<5x3x1x128xf32, #tpu.memory_space<vmem>>, vector<1x1x1x128xf32>
    %494 = vector.shape_cast %493 : vector<1x1x1x128xf32> to vector<1x128xf32>
    %495 = arith.mulf %440, %494 : vector<1x128xf32>
    %c4_381 = arith.constant 4 : index
    %c1_382 = arith.constant 1 : index
    %c0_383 = arith.constant 0 : index
    %c0_384 = arith.constant 0 : index
    %496 = vector.load %arg2[%c4_381, %c1_382, %c0_383, %c0_384] : memref<5x3x1x128xf32, #tpu.memory_space<vmem>>, vector<1x1x1x128xf32>
    %497 = vector.shape_cast %496 : vector<1x1x1x128xf32> to vector<1x128xf32>
    %498 = arith.mulf %444, %497 : vector<1x128xf32>
    %499 = arith.addf %495, %498 : vector<1x128xf32>
    %c4_385 = arith.constant 4 : index
    %c2_386 = arith.constant 2 : index
    %c0_387 = arith.constant 0 : index
    %c0_388 = arith.constant 0 : index
    %500 = vector.load %arg2[%c4_385, %c2_386, %c0_387, %c0_388] : memref<5x3x1x128xf32, #tpu.memory_space<vmem>>, vector<1x1x1x128xf32>
    %501 = vector.shape_cast %500 : vector<1x1x1x128xf32> to vector<1x128xf32>
    %502 = arith.mulf %448, %501 : vector<1x128xf32>
    %503 = arith.addf %499, %502 : vector<1x128xf32>
    %504 = arith.maximumf %459, %470 : vector<1x128xf32>
    %505 = arith.maximumf %504, %481 : vector<1x128xf32>
    %506 = arith.maximumf %505, %492 : vector<1x128xf32>
    %507 = arith.maximumf %506, %503 : vector<1x128xf32>
    %508 = arith.subf %459, %507 : vector<1x128xf32>
    %509 = math.exp %508 : vector<1x128xf32>
    %510 = arith.subf %470, %507 : vector<1x128xf32>
    %511 = math.exp %510 : vector<1x128xf32>
    %512 = arith.subf %481, %507 : vector<1x128xf32>
    %513 = math.exp %512 : vector<1x128xf32>
    %514 = arith.subf %492, %507 : vector<1x128xf32>
    %515 = math.exp %514 : vector<1x128xf32>
    %516 = arith.subf %503, %507 : vector<1x128xf32>
    %517 = math.exp %516 : vector<1x128xf32>
    %518 = arith.addf %509, %511 : vector<1x128xf32>
    %519 = arith.addf %518, %513 : vector<1x128xf32>
    %520 = arith.addf %519, %515 : vector<1x128xf32>
    %521 = arith.addf %520, %517 : vector<1x128xf32>
    %c20_i32 = arith.constant 20 : i32
    %522 = vector.broadcast %c20_i32 : i32 to vector<1x128xi32>
    %523 = arith.shrsi %32, %522 : vector<1x128xi32>
    %c3_i32_389 = arith.constant 3 : i32
    %524 = vector.broadcast %c3_i32_389 : i32 to vector<1x128xi32>
    %525 = arith.andi %523, %524 : vector<1x128xi32>
    %c0_i32_390 = arith.constant 0 : i32
    %526 = vector.broadcast %c0_i32_390 : i32 to vector<1x128xi32>
    %527 = arith.cmpi eq, %525, %526 : vector<1x128xi32>
    %528 = arith.extui %527 : vector<1x128xi1> to vector<1x128xi32>
    %529 = arith.sitofp %528 : vector<1x128xi32> to vector<1x128xf32>
    %530 = arith.mulf %509, %529 : vector<1x128xf32>
    %c22_i32 = arith.constant 22 : i32
    %531 = vector.broadcast %c22_i32 : i32 to vector<1x128xi32>
    %532 = arith.shrsi %32, %531 : vector<1x128xi32>
    %c3_i32_391 = arith.constant 3 : i32
    %533 = vector.broadcast %c3_i32_391 : i32 to vector<1x128xi32>
    %534 = arith.andi %532, %533 : vector<1x128xi32>
    %c0_i32_392 = arith.constant 0 : i32
    %535 = vector.broadcast %c0_i32_392 : i32 to vector<1x128xi32>
    %536 = arith.cmpi eq, %534, %535 : vector<1x128xi32>
    %537 = arith.extui %536 : vector<1x128xi1> to vector<1x128xi32>
    %538 = arith.sitofp %537 : vector<1x128xi32> to vector<1x128xf32>
    %539 = arith.mulf %511, %538 : vector<1x128xf32>
    %c24_i32 = arith.constant 24 : i32
    %540 = vector.broadcast %c24_i32 : i32 to vector<1x128xi32>
    %541 = arith.shrsi %32, %540 : vector<1x128xi32>
    %c3_i32_393 = arith.constant 3 : i32
    %542 = vector.broadcast %c3_i32_393 : i32 to vector<1x128xi32>
    %543 = arith.andi %541, %542 : vector<1x128xi32>
    %c0_i32_394 = arith.constant 0 : i32
    %544 = vector.broadcast %c0_i32_394 : i32 to vector<1x128xi32>
    %545 = arith.cmpi eq, %543, %544 : vector<1x128xi32>
    %546 = arith.extui %545 : vector<1x128xi1> to vector<1x128xi32>
    %547 = arith.sitofp %546 : vector<1x128xi32> to vector<1x128xf32>
    %548 = arith.mulf %513, %547 : vector<1x128xf32>
    %c26_i32 = arith.constant 26 : i32
    %549 = vector.broadcast %c26_i32 : i32 to vector<1x128xi32>
    %550 = arith.shrsi %32, %549 : vector<1x128xi32>
    %c3_i32_395 = arith.constant 3 : i32
    %551 = vector.broadcast %c3_i32_395 : i32 to vector<1x128xi32>
    %552 = arith.andi %550, %551 : vector<1x128xi32>
    %c0_i32_396 = arith.constant 0 : i32
    %553 = vector.broadcast %c0_i32_396 : i32 to vector<1x128xi32>
    %554 = arith.cmpi eq, %552, %553 : vector<1x128xi32>
    %555 = arith.extui %554 : vector<1x128xi1> to vector<1x128xi32>
    %556 = arith.sitofp %555 : vector<1x128xi32> to vector<1x128xf32>
    %557 = arith.mulf %515, %556 : vector<1x128xf32>
    %c28_i32 = arith.constant 28 : i32
    %558 = vector.broadcast %c28_i32 : i32 to vector<1x128xi32>
    %559 = arith.shrsi %32, %558 : vector<1x128xi32>
    %c3_i32_397 = arith.constant 3 : i32
    %560 = vector.broadcast %c3_i32_397 : i32 to vector<1x128xi32>
    %561 = arith.andi %559, %560 : vector<1x128xi32>
    %c0_i32_398 = arith.constant 0 : i32
    %562 = vector.broadcast %c0_i32_398 : i32 to vector<1x128xi32>
    %563 = arith.cmpi eq, %561, %562 : vector<1x128xi32>
    %564 = arith.extui %563 : vector<1x128xi1> to vector<1x128xi32>
    %565 = arith.sitofp %564 : vector<1x128xi32> to vector<1x128xf32>
    %566 = arith.mulf %517, %565 : vector<1x128xf32>
    %567 = tpu.reciprocal %521 {approx = true} : vector<1x128xf32> -> vector<1x128xf32>
    %cst_399 = arith.constant 4.000000e+00 : f32
    %568 = vector.broadcast %cst_399 : f32 to vector<1x128xf32>
    %569 = arith.mulf %567, %568 : vector<1x128xf32>
    %c0_400 = arith.constant 0 : index
    %c0_401 = arith.constant 0 : index
    %c0_402 = arith.constant 0 : index
    %c0_403 = arith.constant 0 : index
    %570 = vector.load %arg2[%c0_400, %c0_401, %c0_402, %c0_403] : memref<5x3x1x128xf32, #tpu.memory_space<vmem>>, vector<1x1x1x128xf32>
    %571 = vector.shape_cast %570 : vector<1x1x1x128xf32> to vector<1x128xf32>
    %572 = arith.mulf %530, %571 : vector<1x128xf32>
    %c1_404 = arith.constant 1 : index
    %c0_405 = arith.constant 0 : index
    %c0_406 = arith.constant 0 : index
    %c0_407 = arith.constant 0 : index
    %573 = vector.load %arg2[%c1_404, %c0_405, %c0_406, %c0_407] : memref<5x3x1x128xf32, #tpu.memory_space<vmem>>, vector<1x1x1x128xf32>
    %574 = vector.shape_cast %573 : vector<1x1x1x128xf32> to vector<1x128xf32>
    %575 = arith.mulf %539, %574 : vector<1x128xf32>
    %576 = arith.addf %572, %575 : vector<1x128xf32>
    %c2_408 = arith.constant 2 : index
    %c0_409 = arith.constant 0 : index
    %c0_410 = arith.constant 0 : index
    %c0_411 = arith.constant 0 : index
    %577 = vector.load %arg2[%c2_408, %c0_409, %c0_410, %c0_411] : memref<5x3x1x128xf32, #tpu.memory_space<vmem>>, vector<1x1x1x128xf32>
    %578 = vector.shape_cast %577 : vector<1x1x1x128xf32> to vector<1x128xf32>
    %579 = arith.mulf %548, %578 : vector<1x128xf32>
    %580 = arith.addf %576, %579 : vector<1x128xf32>
    %c3_412 = arith.constant 3 : index
    %c0_413 = arith.constant 0 : index
    %c0_414 = arith.constant 0 : index
    %c0_415 = arith.constant 0 : index
    %581 = vector.load %arg2[%c3_412, %c0_413, %c0_414, %c0_415] : memref<5x3x1x128xf32, #tpu.memory_space<vmem>>, vector<1x1x1x128xf32>
    %582 = vector.shape_cast %581 : vector<1x1x1x128xf32> to vector<1x128xf32>
    %583 = arith.mulf %557, %582 : vector<1x128xf32>
    %584 = arith.addf %580, %583 : vector<1x128xf32>
    %c4_416 = arith.constant 4 : index
    %c0_417 = arith.constant 0 : index
    %c0_418 = arith.constant 0 : index
    %c0_419 = arith.constant 0 : index
    %585 = vector.load %arg2[%c4_416, %c0_417, %c0_418, %c0_419] : memref<5x3x1x128xf32, #tpu.memory_space<vmem>>, vector<1x1x1x128xf32>
    %586 = vector.shape_cast %585 : vector<1x1x1x128xf32> to vector<1x128xf32>
    %587 = arith.mulf %566, %586 : vector<1x128xf32>
    %588 = arith.addf %584, %587 : vector<1x128xf32>
    %589 = arith.mulf %588, %569 : vector<1x128xf32>
    %c2_420 = arith.constant 2 : index
    %c0_421 = arith.constant 0 : index
    %c0_422 = arith.constant 0 : index
    %c0_423 = arith.constant 0 : index
    %590 = vector.load %arg3[%c2_420, %c0_421, %c0_422, %c0_423] : memref<3x3x1x128xf32, #tpu.memory_space<vmem>>, vector<1x1x1x128xf32>
    %591 = vector.shape_cast %590 : vector<1x1x1x128xf32> to vector<1x128xf32>
    %592 = vector.shape_cast %589 : vector<1x128xf32> to vector<1x1x1x128xf32>
    tpu.vector_store %arg3[%c2_420, %c0_421, %c0_422, %c0_423], %592 {strides = array<i32>} : memref<3x3x1x128xf32, #tpu.memory_space<vmem>>, vector<1x1x1x128xf32>,
    %c0_424 = arith.constant 0 : index
    %c1_425 = arith.constant 1 : index
    %c0_426 = arith.constant 0 : index
    %c0_427 = arith.constant 0 : index
    %593 = vector.load %arg2[%c0_424, %c1_425, %c0_426, %c0_427] : memref<5x3x1x128xf32, #tpu.memory_space<vmem>>, vector<1x1x1x128xf32>
    %594 = vector.shape_cast %593 : vector<1x1x1x128xf32> to vector<1x128xf32>
    %595 = arith.mulf %530, %594 : vector<1x128xf32>
    %c1_428 = arith.constant 1 : index
    %c1_429 = arith.constant 1 : index
    %c0_430 = arith.constant 0 : index
    %c0_431 = arith.constant 0 : index
    %596 = vector.load %arg2[%c1_428, %c1_429, %c0_430, %c0_431] : memref<5x3x1x128xf32, #tpu.memory_space<vmem>>, vector<1x1x1x128xf32>
    %597 = vector.shape_cast %596 : vector<1x1x1x128xf32> to vector<1x128xf32>
    %598 = arith.mulf %539, %597 : vector<1x128xf32>
    %599 = arith.addf %595, %598 : vector<1x128xf32>
    %c2_432 = arith.constant 2 : index
    %c1_433 = arith.constant 1 : index
    %c0_434 = arith.constant 0 : index
    %c0_435 = arith.constant 0 : index
    %600 = vector.load %arg2[%c2_432, %c1_433, %c0_434, %c0_435] : memref<5x3x1x128xf32, #tpu.memory_space<vmem>>, vector<1x1x1x128xf32>
    %601 = vector.shape_cast %600 : vector<1x1x1x128xf32> to vector<1x128xf32>
    %602 = arith.mulf %548, %601 : vector<1x128xf32>
    %603 = arith.addf %599, %602 : vector<1x128xf32>
    %c3_436 = arith.constant 3 : index
    %c1_437 = arith.constant 1 : index
    %c0_438 = arith.constant 0 : index
    %c0_439 = arith.constant 0 : index
    %604 = vector.load %arg2[%c3_436, %c1_437, %c0_438, %c0_439] : memref<5x3x1x128xf32, #tpu.memory_space<vmem>>, vector<1x1x1x128xf32>
    %605 = vector.shape_cast %604 : vector<1x1x1x128xf32> to vector<1x128xf32>
    %606 = arith.mulf %557, %605 : vector<1x128xf32>
    %607 = arith.addf %603, %606 : vector<1x128xf32>
    %c4_440 = arith.constant 4 : index
    %c1_441 = arith.constant 1 : index
    %c0_442 = arith.constant 0 : index
    %c0_443 = arith.constant 0 : index
    %608 = vector.load %arg2[%c4_440, %c1_441, %c0_442, %c0_443] : memref<5x3x1x128xf32, #tpu.memory_space<vmem>>, vector<1x1x1x128xf32>
    %609 = vector.shape_cast %608 : vector<1x1x1x128xf32> to vector<1x128xf32>
    %610 = arith.mulf %566, %609 : vector<1x128xf32>
    %611 = arith.addf %607, %610 : vector<1x128xf32>
    %612 = arith.mulf %611, %569 : vector<1x128xf32>
    %c2_444 = arith.constant 2 : index
    %c1_445 = arith.constant 1 : index
    %c0_446 = arith.constant 0 : index
    %c0_447 = arith.constant 0 : index
    %613 = vector.load %arg3[%c2_444, %c1_445, %c0_446, %c0_447] : memref<3x3x1x128xf32, #tpu.memory_space<vmem>>, vector<1x1x1x128xf32>
    %614 = vector.shape_cast %613 : vector<1x1x1x128xf32> to vector<1x128xf32>
    %615 = vector.shape_cast %612 : vector<1x128xf32> to vector<1x1x1x128xf32>
    tpu.vector_store %arg3[%c2_444, %c1_445, %c0_446, %c0_447], %615 {strides = array<i32>} : memref<3x3x1x128xf32, #tpu.memory_space<vmem>>, vector<1x1x1x128xf32>,
    %c0_448 = arith.constant 0 : index
    %c2_449 = arith.constant 2 : index
    %c0_450 = arith.constant 0 : index
    %c0_451 = arith.constant 0 : index
    %616 = vector.load %arg2[%c0_448, %c2_449, %c0_450, %c0_451] : memref<5x3x1x128xf32, #tpu.memory_space<vmem>>, vector<1x1x1x128xf32>
    %617 = vector.shape_cast %616 : vector<1x1x1x128xf32> to vector<1x128xf32>
    %618 = arith.mulf %530, %617 : vector<1x128xf32>
    %c1_452 = arith.constant 1 : index
    %c2_453 = arith.constant 2 : index
    %c0_454 = arith.constant 0 : index
    %c0_455 = arith.constant 0 : index
    %619 = vector.load %arg2[%c1_452, %c2_453, %c0_454, %c0_455] : memref<5x3x1x128xf32, #tpu.memory_space<vmem>>, vector<1x1x1x128xf32>
    %620 = vector.shape_cast %619 : vector<1x1x1x128xf32> to vector<1x128xf32>
    %621 = arith.mulf %539, %620 : vector<1x128xf32>
    %622 = arith.addf %618, %621 : vector<1x128xf32>
    %c2_456 = arith.constant 2 : index
    %c2_457 = arith.constant 2 : index
    %c0_458 = arith.constant 0 : index
    %c0_459 = arith.constant 0 : index
    %623 = vector.load %arg2[%c2_456, %c2_457, %c0_458, %c0_459] : memref<5x3x1x128xf32, #tpu.memory_space<vmem>>, vector<1x1x1x128xf32>
    %624 = vector.shape_cast %623 : vector<1x1x1x128xf32> to vector<1x128xf32>
    %625 = arith.mulf %548, %624 : vector<1x128xf32>
    %626 = arith.addf %622, %625 : vector<1x128xf32>
    %c3_460 = arith.constant 3 : index
    %c2_461 = arith.constant 2 : index
    %c0_462 = arith.constant 0 : index
    %c0_463 = arith.constant 0 : index
    %627 = vector.load %arg2[%c3_460, %c2_461, %c0_462, %c0_463] : memref<5x3x1x128xf32, #tpu.memory_space<vmem>>, vector<1x1x1x128xf32>
    %628 = vector.shape_cast %627 : vector<1x1x1x128xf32> to vector<1x128xf32>
    %629 = arith.mulf %557, %628 : vector<1x128xf32>
    %630 = arith.addf %626, %629 : vector<1x128xf32>
    %c4_464 = arith.constant 4 : index
    %c2_465 = arith.constant 2 : index
    %c0_466 = arith.constant 0 : index
    %c0_467 = arith.constant 0 : index
    %631 = vector.load %arg2[%c4_464, %c2_465, %c0_466, %c0_467] : memref<5x3x1x128xf32, #tpu.memory_space<vmem>>, vector<1x1x1x128xf32>
    %632 = vector.shape_cast %631 : vector<1x1x1x128xf32> to vector<1x128xf32>
    %633 = arith.mulf %566, %632 : vector<1x128xf32>
    %634 = arith.addf %630, %633 : vector<1x128xf32>
    %635 = arith.mulf %634, %569 : vector<1x128xf32>
    %c2_468 = arith.constant 2 : index
    %c2_469 = arith.constant 2 : index
    %c0_470 = arith.constant 0 : index
    %c0_471 = arith.constant 0 : index
    %636 = vector.load %arg3[%c2_468, %c2_469, %c0_470, %c0_471] : memref<3x3x1x128xf32, #tpu.memory_space<vmem>>, vector<1x1x1x128xf32>
    %637 = vector.shape_cast %636 : vector<1x1x1x128xf32> to vector<1x128xf32>
    %638 = vector.shape_cast %635 : vector<1x128xf32> to vector<1x1x1x128xf32>
    tpu.vector_store %arg3[%c2_468, %c2_469, %c0_470, %c0_471], %638 {strides = array<i32>} : memref<3x3x1x128xf32, #tpu.memory_space<vmem>>, vector<1x1x1x128xf32>,
    return
  }
  func.func @transform_0(%arg0: i32) -> (i32, i32, i32, i32) {
    %c0_i32 = arith.constant 0 : i32
    %c0_i32_0 = arith.constant 0 : i32
    %c0_i32_1 = arith.constant 0 : i32
    %c0_i32_2 = arith.constant 0 : i32
    return %c0_i32, %c0_i32_0, %arg0, %c0_i32_1 : i32, i32, i32, i32
  }
  func.func @transform_1(%arg0: i32) -> (i32, i32, i32, i32) {
    %c0_i32 = arith.constant 0 : i32
    %c0_i32_0 = arith.constant 0 : i32
    %c0_i32_1 = arith.constant 0 : i32
    %c0_i32_2 = arith.constant 0 : i32
    return %c0_i32, %c0_i32_0, %arg0, %c0_i32_1 : i32, i32, i32, i32
  }
  func.func @transform_2(%arg0: i32) -> (i32, i32, i32, i32) {
    %c0_i32 = arith.constant 0 : i32
    %c0_i32_0 = arith.constant 0 : i32
    %c0_i32_1 = arith.constant 0 : i32
    %c0_i32_2 = arith.constant 0 : i32
    return %c0_i32, %c0_i32_0, %arg0, %c0_i32_1 : i32, i32, i32, i32
  }
}

</mosaic_0001>

<bundles_post_ra>
// kernel: tpu_custom_call.1
= control target key start
LH: loop header
LB: loop body
LE: loop exit
PB: predicated region body
PF: predicated region fallthrough
CT: control target
= control target key end

     0   :  { %7 = vsyncpa [#allocation3], 0  ;;  %s883_s0 = inlined_call_operand.hbm [shape: f32[3,3,1,128], index: 0, kind: input, shape index: {}]   ;;  %s884_s1 = inlined_call_operand.hbm [shape: f32[5,3,1,128], index: 1, kind: input, shape index: {}]   ;;  %s885_s2 = inlined_call_operand.hbm [shape: f32[3,3,1,128], index: 2, kind: output, shape index: {}]  }
   0x1   :  { %8 = vsyncpa [#allocation6], 0 }
   0x2   :  { %9 = vsyncpa [#allocation4], 0  ;;  %s14_s11 = sshll.u32 %s883_s0, 4  ;;  %s684_s12 = smov [#allocation2]   ;;  %s15_s11 = int_to_ptr.hbm [resolvable:$true] %s14_s11 }
   0x3   :  { %s16_s13 = sshll.u32 %s684_s12, 4  ;;  %s27_s16 = sshll.u32 %s884_s1, 4  ;;  %s17_s13 = int_to_ptr.vmem [resolvable:$true] %s16_s13  ;;  %s28_s16 = int_to_ptr.hbm [resolvable:$true] %s27_s16 }
   0x4   :  { %s685_s17 = smov 16   ;;  %s686_s18 = smov 1  }
   0x5   :  { %22 = dma.hbm_to_vmem [thread:$0]  %s15_s11, 144, %s17_s13, [#allocation3], %s685_s17, %s685_s17, %s686_s18  }
   0x6   :  { %s687_s19 = smov [#allocation5]  }
   0x7   :  { %s29_s20 = sshll.u32 %s687_s19, 4  ;;  %s30_s20 = int_to_ptr.vmem [resolvable:$true] %s29_s20 }
   0x8   :  { %35 = dma.hbm_to_vmem [thread:$0]  %s28_s16, 240, %s30_s20, [#allocation6], %s685_s17, %s685_s17, %s686_s18  }
   0x9   :  { %678 = dma.done.wait [#allocation3], 144  }
   0xa   :  { %679 = vsyncadd [#allocation3], 4294967152 }
   0xb   :  { %680 = dma.done.wait [#allocation6], 240  }
   0xc   :  { %681 = vsyncadd [#allocation6], 4294967056  ;;  %v45_v0 = vlaneseq  ;;  %v65_v5 = vld [vmem:[#allocation2] sm:$0x1]  ;;  %v68_v6 = vld [vmem:[#allocation2 + $0x1] sm:$0x1] }
   0xd   :  { %v71_v7 = vld [vmem:[#allocation2 + $0x2] sm:$0x1]  ;;  %v66_v9 = vmul.f32 0.1, %v65_v5  ;;  %v69_v10 = vmul.f32 0.1, %v68_v6 }
   0xe   :  { %v46_v1 = vshrl.u32 %v45_v0, 7  ;;  %v48_v2 = vand.u32 127, %v45_v0  ;;  %v72_v11 = vmul.f32 0.1, %v71_v7  ;;  %v717_v12 = vld [vmem:[#allocation5] sm:$0x1] }
   0xf   :  { %v76_v13 = vld [vmem:[#allocation5 + $0x1] sm:$0x1]  ;;  %v74_v15 = vmul.f32 %v717_v12, %v66_v9  ;;  %v80_v17 = vld [vmem:[#allocation5 + $0x2] sm:$0x1]  ;;  %v720_v18 = vld [vmem:[#allocation5 + $0x3] sm:$0x1] }
  0x10   :  { %v49_v3 = vmul.u32 128, %v46_v1  ;;  %v77_v16 = vmul.f32 %v76_v13, %v69_v10  ;;  %v81_v19 = vmul.f32 %v80_v17, %v72_v11  ;;  %v85_v20 = vmul.f32 %v720_v18, %v66_v9  ;;  %v87_v21 = vld [vmem:[#allocation5 + $0x4] sm:$0x1]  ;;  %v91_v22 = vld [vmem:[#allocation5 + $0x5] sm:$0x1]  ;;  %s689_s0 = smov [#allocation7]  }
  0x11   :  { %v723_v23 = vld [vmem:[#allocation5 + $0x6] sm:$0x1]  ;;  %v88_v26 = vmul.f32 %v87_v21, %v69_v10  ;;  %v92_v27 = vmul.f32 %v91_v22, %v72_v11  ;;  %v98_v28 = vld [vmem:[#allocation5 + $0x7] sm:$0x1]  ;;  %v102_v29 = vld [vmem:[#allocation5 + $0x8] sm:$0x1] }
  0x12   :  { %v52_v4 = vadd.s32 %v49_v3, %v48_v2  ;;  %v78_v25 = vadd.f32 %v77_v16, %v74_v15  ;;  %v725_v30 = vld [vmem:[#allocation5 + $0x9] sm:$0x1]  ;;  %v96_v31 = vmul.f32 %v723_v23, %v66_v9  ;;  %v99_v32 = vmul.f32 %v98_v28, %v69_v10  ;;  %v109_v35 = vld [vmem:[#allocation5 + $0xa] sm:$0x1]  ;;  %v113_v36 = vld [vmem:[#allocation5 + $0xb] sm:$0x1] }
  0x13   :  { %v103_v33 = vmul.f32 %v102_v29, %v72_v11  ;;  %v107_v34 = vmul.f32 %v725_v30, %v66_v9  ;;  %v729_v37 = vld [vmem:[#allocation5 + $0xc] sm:$0x1]  ;;  %v89_v40 = vadd.f32 %v88_v26, %v85_v20  ;;  %v110_v41 = vmul.f32 %v109_v35, %v69_v10  ;;  %v120_v42 = vld [vmem:[#allocation5 + $0xd] sm:$0x1]  ;;  %v124_v43 = vld [vmem:[#allocation5 + $0xe] sm:$0x1] }
  0x14   :  { %v53_v8 = vxor.u32 2135587861, %v52_v4  ;;  %v82_v39 = vadd.f32 %v81_v19, %v78_v25  ;;  %v100_v44 = vadd.f32 %v99_v32, %v96_v31  ;;  %v114_v45 = vmul.f32 %v113_v36, %v72_v11  ;;  %v227_v57 = vld [vmem:[#allocation2 + $0x3] sm:$0x1]  ;;  %v230_v58 = vld [vmem:[#allocation2 + $0x4] sm:$0x1] }
  0x15   :  { %v118_v46 = vmul.f32 %v729_v37, %v66_v9  ;;  %v121_v47 = vmul.f32 %v120_v42, %v69_v10  ;;  %v93_v49 = vadd.f32 %v92_v27, %v89_v40  ;;  %v111_v50 = vadd.f32 %v110_v41, %v107_v34  ;;  %v233_v0 = vld [vmem:[#allocation2 + $0x5] sm:$0x1]  ;;  %v736_v1 = vld [vmem:[#allocation5] sm:$0x1]  ;;  %v237_v4 = vld [vmem:[#allocation5 + $0x1] sm:$0x1] }
  0x16   :  { %v546_v14 = vshrl.u32 %v53_v8, 16  ;;  %v125_v51 = vmul.f32 %v124_v43, %v72_v11  ;;  %v104_v52 = vadd.f32 %v103_v33, %v100_v44  ;;  %v732_v59 = vmul.f32 0.1, %v227_v57  ;;  %v240_v5 = vld [vmem:[#allocation5 + $0x2] sm:$0x1]  ;;  %s530_s1 = sshll.u32 %s689_s0, 4  ;;  %s531_s1 = int_to_ptr.vmem [resolvable:$true] %s530_s1 }
  0x17   :  { %v122_v53 = vadd.f32 %v121_v47, %v118_v46  ;;  %v115_v55 = vadd.f32 %v114_v45, %v111_v50  ;;  %v127_v56 = vmax.f32 %v82_v39, %v93_v49  ;;  %v734_v60 = vmul.f32 0.1, %v230_v58  ;;  %v743_v9 = vld [vmem:[#allocation5 + $0x3] sm:$0x1]  ;;  %v245_v10 = vld [vmem:[#allocation5 + $0x4] sm:$0x1] }
  0x18   :  { %v56_v24 = vxor.u32 %v546_v14, %v53_v8  ;;  %v738_v2 = vmul.f32 0.1, %v233_v0  ;;  %v236_v3 = vmul.f32 %v736_v1, %v732_v59  ;;  %v244_v13 = vmul.f32 %v743_v9, %v732_v59  ;;  %v248_v15 = vld [vmem:[#allocation5 + $0x5] sm:$0x1]  ;;  %v749_v16 = vld [vmem:[#allocation5 + $0x6] sm:$0x1] }
  0x19   :  { %v126_v62 = vadd.f32 %v125_v51, %v122_v53  ;;  %v128_v63 = vmax.f32 %v127_v56, %v104_v52  ;;  %v238_v8 = vmul.f32 %v237_v4, %v734_v60  ;;  %v246_v14 = vmul.f32 %v245_v10, %v734_v60  ;;  %v253_v17 = vld [vmem:[#allocation5 + $0x7] sm:$0x1]  ;;  %v261_v53 = vld [vmem:[#allocation5 + $0xa] sm:$0x1]  ;;  %v264_v56 = vld [vmem:[#allocation5 + $0xb] sm:$0x1] }
  0x1a   :  { %v57_v38 = vmul.u32 2246822507, %v56_v24  ;;  %v241_v11 = vmul.f32 %v240_v5, %v738_v2  ;;  %v249_v22 = vmul.f32 %v248_v15, %v738_v2  ;;  %v256_v24 = vld [vmem:[#allocation5 + $0x8] sm:$0x1]  ;;  %v252_v26 = vmul.f32 %v749_v16, %v732_v59  ;;  %v272_v4 = vld [vmem:[#allocation5 + $0xe] sm:$0x1] }
  0x1b   :  { %v129_v7 = vmax.f32 %v128_v63, %v115_v55  ;;  %v239_v21 = vadd.f32 %v238_v8, %v236_v3  ;;  %v247_v25 = vadd.f32 %v246_v14, %v244_v13  ;;  %v254_v27 = vmul.f32 %v253_v17, %v734_v60  ;;  %v269_v63 = vld [vmem:[#allocation5 + $0xd] sm:$0x1]  ;;  %v209_v13 = vld [vmem:[#allocation5 + $0x2] sm:$0x1]  ;;  %s532_s23 = sshll.u32 %s885_s2, 4  ;;  %s533_s23 = int_to_ptr.hbm [resolvable:$true] %s532_s23 }
  0x1c   :  { %v547_v48 = vshrl.u32 %v57_v38, 13  ;;  %v257_v28 = vmul.f32 %v256_v24, %v738_v2  ;;  %v262_v3 = vmul.f32 %v261_v53, %v734_v60  ;;  %v270_v17 = vmul.f32 %v269_v63, %v734_v60  ;;  %v214_v53 = vld [vmem:[#allocation5 + $0x8] sm:$0x1] }
  0x1d   :  { %v130_v20 = vmax.f32 %v129_v7, %v126_v62  ;;  %v761_v43 = vadd.f32 %v241_v11, %v239_v21  ;;  %v766_v51 = vadd.f32 %v249_v22, %v247_v25  ;;  %v265_v7 = vmul.f32 %v264_v56, %v738_v2  ;;  %v192_v11 = vld [vmem:[#allocation5 + $0x1] sm:$0x1]  ;;  %v194_v22 = vld [vmem:[#allocation5 + $0x4] sm:$0x1] }
  0x1e   :  { %v60_v54 = vxor.u32 %v547_v48, %v57_v38  ;;  %v273_v24 = vmul.f32 %v272_v4, %v738_v2 }
  0x1f   :  { %v131_v29 = vsub.f32 %v82_v39, %v130_v20  ;;  %v134_v31 = vsub.f32 %v93_v49, %v130_v20  ;;  %v137_v32 = vsub.f32 %v104_v52, %v130_v20  ;;  %v140_v33 = vsub.f32 %v115_v55, %v130_v20  ;;  %v768_v52 = vld [vmem:[#allocation5 + $0x9] sm:$0x1] }
  0x20   :  { %v61_v61 = vmul.u32 3266489909, %v60_v54  ;;  %v143_v34 = vsub.f32 %v126_v62, %v130_v20  ;;  %v688_v39 = vmov 0.0   ;;  %v772_v62 = vld [vmem:[#allocation5 + $0xc] sm:$0x1]  ;;  %v260_v0 = vmul.f32 %v768_v52, %v732_v59 }
  0x21   :  { %v132_v40 = vmul.f32 1.442695, %v131_v29  ;;  %v135_v41 = vmul.f32 1.442695, %v134_v31  ;;  %v138_v42 = vmul.f32 1.442695, %v137_v32  ;;  %v268_v15 = vmul.f32 %v772_v62, %v732_v59 }
  0x22   :  { %v548_v6 = vshrl.u32 %v61_v61, 16  ;;  %v141_v44 = vmul.f32 1.442695, %v140_v33  ;;  %v144_v45 = vmul.f32 1.442695, %v143_v34  ;;  %v263_v14 = vadd.f32 %v262_v3, %v260_v0 }
  0x23   :  { %570 = vpow2.f32 %v132_v40  ;;  %v275_v25 = vmax.f32 %v761_v43, %v766_v51  ;;  %v197_v31 = vld [vmem:[#allocation5 + $0x7] sm:$0x1]  ;;  %v211_v32 = vld [vmem:[#allocation5 + $0x5] sm:$0x1]  ;;  %v271_v59 = vadd.f32 %v270_v17, %v268_v15 }
  0x24   :  { %v751_v19 = vxor.u32 %v548_v6, %v61_v61  ;;  %572 = vpow2.f32 %v135_v41  ;;  %v255_v61 = vadd.f32 %v254_v27, %v252_v26  ;;  %v789_v33 = vadd.f32 %v265_v7, %v263_v14 }
  0x25   :  { %574 = vpow2.f32 %v138_v42 }
  0x26   :  { %v150_v35 = vand.u32 3, %v751_v19  ;;  %v155_v36 = vshra.s32 %v751_v19, 2  ;;  %v161_v38 = vshra.s32 %v751_v19, 4  ;;  %v167_v49 = vshra.s32 %v751_v19, 6 }
  0x27   :  { %v173_v50 = vshra.s32 %v751_v19, 8  ;;  %576 = vpow2.f32 %v141_v44  ;;  %v778_v6 = vadd.f32 %v257_v28, %v255_v61  ;;  %v298_v26 = vshra.s32 %v751_v19, 10 }
  0x28   :  { %vm151_vm0 = vcmp.eq.s32.totalorder %v150_v35, 0  ;;  %v156_v46 = vand.u32 3, %v155_v36  ;;  %v162_v48 = vand.u32 3, %v161_v38  ;;  %v168_v55 = vand.u32 3, %v167_v49 }
  0x29   :  { %v549_v47 = vsel %vm151_vm0, 1.0, %v688_v39  ;;  %v174_v58 = vand.u32 3, %v173_v50  ;;  %578 = vpow2.f32 %v144_v45  ;;  %v571_v8 = vpop.eup %570  ;;  %v200_v45 = vld [vmem:[#allocation5 + $0xa] sm:$0x1]  ;;  %v299_v17 = vand.u32 3, %v298_v26 }
  0x2a   :  { %vm157_vm1 = vcmp.eq.s32.totalorder %v156_v46, 0  ;;  %vm163_vm2 = vcmp.eq.s32.totalorder %v162_v48, 0  ;;  %vm169_vm3 = vcmp.eq.s32.totalorder %v168_v55, 0  ;;  %v573_v20 = vpop.eup %572  ;;  %v154_v21 = vmul.f32 %v571_v8, %v549_v47  ;;  %v203_v46 = vld [vmem:[#allocation5 + $0xd] sm:$0x1] }
  0x2b   :  { %v550_v54 = vsel %vm157_vm1, 1.0, %v688_v39  ;;  %v551_v57 = vsel %vm163_vm2, 1.0, %v688_v39  ;;  %v552_v5 = vsel %vm169_vm3, 1.0, %v688_v39  ;;  %vm175_vm4 = vcmp.eq.s32.totalorder %v174_v58, 0  ;;  %v575_v27 = vpop.eup %574  ;;  %v220_v58 = vld [vmem:[#allocation5 + $0xe] sm:$0x1] }
  0x2c   :  { %v553_v10 = vsel %vm175_vm4, 1.0, %v688_v39  ;;  %v146_v28 = vadd.f32 %v573_v20, %v571_v8  ;;  %v160_v29 = vmul.f32 %v573_v20, %v550_v54  ;;  %v166_v60 = vmul.f32 %v575_v27, %v551_v57  ;;  %v217_v57 = vld [vmem:[#allocation5 + $0xb] sm:$0x1] }
  0x2d   :  { %v577_v34 = vpop.eup %576  ;;  %v181_v35 = vmul.f32 %v154_v21, %v717_v12  ;;  %v193_v36 = vmul.f32 %v192_v11, %v154_v21  ;;  %v210_v38 = vmul.f32 %v209_v13, %v154_v21  ;;  %v276_v11 = vmax.f32 %v275_v25, %v778_v6 }
  0x2e   :  { %v147_v40 = vadd.f32 %v575_v27, %v146_v28  ;;  %v172_v41 = vmul.f32 %v577_v34, %v552_v5  ;;  %v182_v42 = vmul.f32 %v160_v29, %v720_v18  ;;  %v195_v44 = vmul.f32 %v194_v22, %v160_v29 }
  0x2f   :  { %v579_v2 = vpop.eup %578  ;;  %v184_v48 = vmul.f32 %v166_v60, %v723_v23  ;;  %v198_v49 = vmul.f32 %v197_v31, %v166_v60  ;;  %v212_v50 = vmul.f32 %v211_v32, %v160_v29  ;;  %v215_v7 = vmul.f32 %v214_v53, %v166_v60  ;;  %v390_v53 = vld [vmem:[#allocation5 + $0x2] sm:$0x1] }
  0x30   :  { %v178_v47 = vmul.f32 %v579_v2, %v553_v10  ;;  %v148_v54 = vadd.f32 %v577_v34, %v147_v40  ;;  %v183_v55 = vadd.f32 %v182_v42, %v181_v35  ;;  %v186_v12 = vmul.f32 %v172_v41, %v725_v30  ;;  %v377_v40 = vld [vmem:[#allocation2 + $0x6] sm:$0x1] }
  0x31   :  { %v196_v56 = vadd.f32 %v195_v44, %v193_v36  ;;  %v201_v63 = vmul.f32 %v200_v45, %v172_v41  ;;  %v213_v0 = vadd.f32 %v212_v50, %v210_v38  ;;  %v218_v23 = vmul.f32 %v217_v57, %v172_v41  ;;  %v380_v41 = vld [vmem:[#allocation2 + $0x7] sm:$0x1] }
  0x32   :  { %v188_v61 = vmul.f32 %v178_v47, %v729_v37  ;;  %v204_v18 = vmul.f32 %v203_v46, %v178_v47  ;;  %v149_v3 = vadd.f32 %v579_v2, %v148_v54  ;;  %v185_v4 = vadd.f32 %v184_v48, %v183_v55  ;;  %v383_v46 = vld [vmem:[#allocation2 + $0x8] sm:$0x1]  ;;  %v809_v48 = vld [vmem:[#allocation5] sm:$0x1]  ;;  %v811_v54 = vld [vmem:[#allocation5 + $0x3] sm:$0x1] }
  0x33   :  { %v199_v5 = vadd.f32 %v198_v49, %v196_v56  ;;  %v221_v8 = vmul.f32 %v220_v58, %v178_v47  ;;  %v274_v10 = vadd.f32 %v273_v24, %v271_v59  ;;  %v216_v14 = vadd.f32 %v215_v7, %v213_v0  ;;  %v395_v55 = vld [vmem:[#allocation5 + $0x4] sm:$0x1] }
  0x34   :  { %580 = vrcp.f32 %v149_v3  ;;  %v187_v13 = vadd.f32 %v186_v12, %v185_v4  ;;  %v277_v15 = vmax.f32 %v276_v11, %v789_v33  ;;  %v304_v37 = vshra.s32 %v751_v19, 12  ;;  %v398_v12 = vld [vmem:[#allocation5 + $0x5] sm:$0x1]  ;;  %v823_v4 = vld [vmem:[#allocation5 + $0x9] sm:$0x1] }
  0x35   :  { %v202_v30 = vadd.f32 %v201_v63, %v199_v5  ;;  %v310_v20 = vshra.s32 %v751_v19, 14  ;;  %v219_v22 = vadd.f32 %v218_v23, %v216_v14  ;;  %v316_v27 = vshra.s32 %v751_v19, 16  ;;  %v403_v63 = vld [vmem:[#allocation5 + $0x7] sm:$0x1]  ;;  %v411_v11 = vld [vmem:[#allocation5 + $0xa] sm:$0x1] }
  0x36   :  { %v189_v21 = vadd.f32 %v188_v61, %v187_v13  ;;  %v278_v28 = vmax.f32 %v277_v15, %v274_v10  ;;  %vm300_vm5 = vcmp.eq.s32.totalorder %v299_v17, 0  ;;  %v305_v24 = vand.u32 3, %v304_v37  ;;  %v817_v61 = vld [vmem:[#allocation5 + $0x6] sm:$0x1]  ;;  %v342_v37 = vld [vmem:[#allocation5 + $0x1] sm:$0x1] }
  0x37   :  { %v311_v29 = vand.u32 3, %v310_v20  ;;  %v205_v25 = vadd.f32 %v204_v18, %v202_v30  ;;  %v222_v31 = vadd.f32 %v221_v8, %v219_v22  ;;  %v802_v32 = vsel %vm300_vm5, 1.0, %v688_v39  ;;  %v406_v18 = vld [vmem:[#allocation5 + $0x8] sm:$0x1]  ;;  %v359_v20 = vld [vmem:[#allocation5 + $0x2] sm:$0x1] }
  0x38   :  { %v317_v59 = vand.u32 3, %v316_v27  ;;  %v279_v26 = vsub.f32 %v761_v43, %v278_v28  ;;  %v282_v34 = vsub.f32 %v766_v51, %v278_v28  ;;  %v285_v60 = vsub.f32 %v778_v6, %v278_v28  ;;  %v387_v6 = vld [vmem:[#allocation5 + $0x1] sm:$0x1] }
  0x39   :  { %v288_v35 = vsub.f32 %v789_v33, %v278_v28  ;;  %v291_v38 = vsub.f32 %v274_v10, %v278_v28  ;;  %vm306_vm6 = vcmp.eq.s32.totalorder %v305_v24, 0  ;;  %vm312_vm7 = vcmp.eq.s32.totalorder %v311_v29, 0 }
  0x3a   :  { %v581_v36 = vpop.eup %580  ;;  %v322_v2 = vshra.s32 %v751_v19, 18  ;;  %v280_v44 = vmul.f32 1.442695, %v279_v26  ;;  %v283_v45 = vmul.f32 1.442695, %v282_v34  ;;  %vm318_vm8 = vcmp.eq.s32.totalorder %v317_v59, 0 }
  0x3b   :  { %v180_v42 = vmul.f32 4.0, %v581_v36  ;;  %v286_v43 = vmul.f32 1.442695, %v285_v60  ;;  %v289_v47 = vmul.f32 1.442695, %v288_v35  ;;  %v555_v56 = vsel %vm306_vm6, 1.0, %v688_v39 }
  0x3c   :  { %v292_v51 = vmul.f32 1.442695, %v291_v38  ;;  %582 = vpow2.f32 %v280_v44  ;;  %v556_v57 = vsel %vm312_vm7, 1.0, %v688_v39  ;;  %v323_v58 = vand.u32 3, %v322_v2  ;;  %v347_v36 = vld [vmem:[#allocation5 + $0x7] sm:$0x1] }
  0x3d   :  { %v190_v33 = vmul.f32 %v189_v21, %v180_v42  ;;  %v206_v49 = vmul.f32 %v205_v25, %v180_v42  ;;  %v223_v50 = vmul.f32 %v222_v31, %v180_v42  ;;  %584 = vpow2.f32 %v283_v45  ;;  %v344_v25 = vld [vmem:[#allocation5 + $0x4] sm:$0x1]  ;;  %v361_v38 = vld [vmem:[#allocation5 + $0x5] sm:$0x1] }
  0x3e   :  { %586 = vpow2.f32 %v286_v43  ;;  %v819_v0 = vmul.f32 0.1, %v377_v40  ;;  %v821_v3 = vmul.f32 0.1, %v380_v41  ;;  %v557_v5 = vsel %vm318_vm8, 1.0, %v688_v39 }
  0x3f   :  { %191 = vst [vmem:[#allocation7] sm:$0x1] %v190_v33  ;;  %588 = vpow2.f32 %v289_v47  ;;  %vm324_vm9 = vcmp.eq.s32.totalorder %v323_v58, 0  ;;  %v827_v7 = vmul.f32 0.1, %v383_v46 }
  0x40   :  { %208 = vst [vmem:[#allocation7 + $0x1] sm:$0x1] %v206_v49  ;;  %590 = vpow2.f32 %v292_v51  ;;  %v558_v23 = vsel %vm324_vm9, 1.0, %v688_v39  ;;  %v386_v8 = vmul.f32 %v809_v48, %v819_v0  ;;  %v388_v10 = vmul.f32 %v387_v6, %v821_v3  ;;  %v350_v33 = vld [vmem:[#allocation5 + $0xa] sm:$0x1] }
  0x41   :  { %225 = vst [vmem:[#allocation7 + $0x2] sm:$0x1] %v223_v50  ;;  %v391_v13 = vmul.f32 %v390_v53, %v827_v7  ;;  %v394_v30 = vmul.f32 %v811_v54, %v819_v0  ;;  %v396_v14 = vmul.f32 %v395_v55, %v821_v3  ;;  %v399_v15 = vmul.f32 %v398_v12, %v827_v7  ;;  %v353_v49 = vld [vmem:[#allocation5 + $0xd] sm:$0x1] }
  0x42   :  { %v583_v17 = vpop.eup %582  ;;  %v389_v21 = vadd.f32 %v388_v10, %v386_v8  ;;  %v402_v22 = vmul.f32 %v817_v61, %v819_v0  ;;  %v404_v27 = vmul.f32 %v403_v63, %v821_v3  ;;  %v407_v28 = vmul.f32 %v406_v18, %v827_v7  ;;  %v367_v18 = vld [vmem:[#allocation5 + $0xb] sm:$0x1]  ;;  %v370_v8 = vld [vmem:[#allocation5 + $0xe] sm:$0x1] }
  0x43   :  { %v585_v24 = vpop.eup %584  ;;  %v303_v29 = vmul.f32 %v583_v17, %v802_v32  ;;  %v397_v31 = vadd.f32 %v396_v14, %v394_v30  ;;  %v410_v59 = vmul.f32 %v823_v4, %v819_v0  ;;  %v412_v26 = vmul.f32 %v411_v11, %v821_v3 }
  0x44   :  { %v587_v34 = vpop.eup %586  ;;  %v294_v60 = vadd.f32 %v585_v24, %v583_v17  ;;  %v309_v35 = vmul.f32 %v585_v24, %v555_v56  ;;  %v846_v2 = vadd.f32 %v391_v13, %v389_v21  ;;  %v405_v40 = vadd.f32 %v404_v27, %v402_v22  ;;  %v364_v56 = vld [vmem:[#allocation5 + $0x8] sm:$0x1]  ;;  %v853_v17 = vld [vmem:[#allocation5 + $0xc] sm:$0x1]  ;;  %v422_v27 = vld [vmem:[#allocation5 + $0xe] sm:$0x1] }
  0x45   :  { %v589_v41 = vpop.eup %588  ;;  %v315_v42 = vmul.f32 %v587_v34, %v556_v57  ;;  %v330_v44 = vmul.f32 %v303_v29, %v736_v1  ;;  %v343_v32 = vmul.f32 %v342_v37, %v303_v29  ;;  %v360_v45 = vmul.f32 %v359_v20, %v303_v29  ;;  %v419_v37 = vld [vmem:[#allocation5 + $0xd] sm:$0x1] }
  0x46   :  { %v591_v46 = vpop.eup %590  ;;  %v295_v43 = vadd.f32 %v587_v34, %v294_v60  ;;  %v321_v47 = vmul.f32 %v589_v41, %v557_v5  ;;  %v331_v51 = vmul.f32 %v309_v35, %v743_v9  ;;  %v345_v6 = vmul.f32 %v344_v25, %v309_v35 }
  0x47   :  { %v327_v50 = vmul.f32 %v591_v46, %v558_v23  ;;  %v333_v53 = vmul.f32 %v315_v42, %v749_v16  ;;  %v348_v55 = vmul.f32 %v347_v36, %v315_v42  ;;  %v362_v12 = vmul.f32 %v361_v38, %v309_v35  ;;  %v414_v16 = vld [vmem:[#allocation5 + $0xb] sm:$0x1] }
  0x48   :  { %v296_v58 = vadd.f32 %v589_v41, %v295_v43  ;;  %v332_v57 = vadd.f32 %v331_v51, %v330_v44  ;;  %v335_v1 = vmul.f32 %v321_v47, %v768_v52  ;;  %v346_v63 = vadd.f32 %v345_v6, %v343_v32 }
  0x49   :  { %v337_v5 = vmul.f32 %v327_v50, %v772_v62  ;;  %v351_v10 = vmul.f32 %v350_v33, %v321_v47  ;;  %v354_v9 = vmul.f32 %v353_v49, %v327_v50  ;;  %v363_v11 = vadd.f32 %v362_v12, %v360_v45 }
  0x4a   :  { %v297_v13 = vadd.f32 %v591_v46, %v296_v58  ;;  %v334_v30 = vadd.f32 %v333_v53, %v332_v57  ;;  %v349_v23 = vadd.f32 %v348_v55, %v346_v63  ;;  %v365_v14 = vmul.f32 %v364_v56, %v315_v42 }
  0x4b   :  { %v368_v20 = vmul.f32 %v367_v18, %v321_v47  ;;  %v371_v21 = vmul.f32 %v370_v8, %v327_v50  ;;  %v400_v22 = vadd.f32 %v399_v15, %v397_v31  ;;  %v408_v52 = vadd.f32 %v407_v28, %v405_v40 }
  0x4c   :  { %592 = vrcp.f32 %v297_v13  ;;  %v336_v24 = vadd.f32 %v335_v1, %v334_v30  ;;  %v352_v29 = vadd.f32 %v351_v10, %v349_v23  ;;  %v366_v62 = vadd.f32 %v365_v14, %v363_v11  ;;  %v492_v30 = vld [vmem:[#allocation5 + $0x1] sm:$0x1]  ;;  %v509_v23 = vld [vmem:[#allocation5 + $0x2] sm:$0x1] }
  0x4d   :  { %v413_v25 = vadd.f32 %v412_v26, %v410_v59  ;;  %v415_v34 = vmul.f32 %v414_v16, %v827_v7  ;;  %v418_v60 = vmul.f32 %v853_v17, %v819_v0  ;;  %v420_v35 = vmul.f32 %v419_v37, %v821_v3 }
  0x4e   :  { %v369_v36 = vadd.f32 %v368_v20, %v366_v62  ;;  %v423_v38 = vmul.f32 %v422_v27, %v827_v7  ;;  %v425_v15 = vmax.f32 %v846_v2, %v400_v22  ;;  %v338_v28 = vadd.f32 %v337_v5, %v336_v24  ;;  %v494_v20 = vld [vmem:[#allocation5 + $0x4] sm:$0x1]  ;;  %v497_v24 = vld [vmem:[#allocation5 + $0x7] sm:$0x1] }
  0x4f   :  { %v416_v41 = vadd.f32 %v415_v34, %v413_v25  ;;  %v421_v42 = vadd.f32 %v420_v35, %v418_v60  ;;  %v355_v31 = vadd.f32 %v354_v9, %v352_v29  ;;  %v448_v46 = vshra.s32 %v751_v19, 20  ;;  %v511_v29 = vld [vmem:[#allocation5 + $0x5] sm:$0x1] }
  0x50   :  { %v372_v40 = vadd.f32 %v371_v21, %v369_v36  ;;  %v426_v32 = vmax.f32 %v425_v15, %v408_v52  ;;  %v454_v0 = vshra.s32 %v751_v19, 22  ;;  %v460_v51 = vshra.s32 %v751_v19, 24  ;;  %v500_v15 = vld [vmem:[#allocation5 + $0xa] sm:$0x1] }
  0x51   :  { %v424_v44 = vadd.f32 %v423_v38, %v421_v42  ;;  %v466_v6 = vshra.s32 %v751_v19, 26  ;;  %v449_v12 = vand.u32 3, %v448_v46  ;;  %v472_v58 = vshra.s32 %v751_v19, 28  ;;  %v517_v46 = vld [vmem:[#allocation5 + $0xb] sm:$0x1] }
  0x52   :  { %v593_v59 = vpop.eup %592  ;;  %v427_v45 = vmax.f32 %v426_v32, %v416_v41  ;;  %v455_v56 = vand.u32 3, %v454_v0  ;;  %v461_v8 = vand.u32 3, %v460_v51 }
  0x53   :  { %v329_v26 = vmul.f32 4.0, %v593_v59  ;;  %v467_v5 = vand.u32 3, %v466_v6  ;;  %vm450_vm10 = vcmp.eq.s32.totalorder %v449_v12, 0  ;;  %v520_v6 = vld [vmem:[#allocation5 + $0xe] sm:$0x1] }
  0x54   :  { %v428_v7 = vmax.f32 %v427_v45, %v424_v44  ;;  %vm456_vm11 = vcmp.eq.s32.totalorder %v455_v56, 0  ;;  %vm462_vm12 = vcmp.eq.s32.totalorder %v461_v8, 0  ;;  %v559_v9 = vsel %vm450_vm10, 1.0, %v688_v39 }
  0x55   :  { %v339_v3 = vmul.f32 %v338_v28, %v329_v26  ;;  %v356_v43 = vmul.f32 %v355_v31, %v329_v26  ;;  %v373_v47 = vmul.f32 %v372_v40, %v329_v26  ;;  %vm468_vm13 = vcmp.eq.s32.totalorder %v467_v5, 0 }
  0x56   :  { %v429_v33 = vsub.f32 %v846_v2, %v428_v7  ;;  %v432_v49 = vsub.f32 %v400_v22, %v428_v7  ;;  %v435_v50 = vsub.f32 %v408_v52, %v428_v7  ;;  %v438_v53 = vsub.f32 %v416_v41, %v428_v7 }
  0x57   :  { %341 = vst [vmem:[#allocation7 + $0x3] sm:$0x1] %v339_v3  ;;  %v441_v55 = vsub.f32 %v424_v44, %v428_v7  ;;  %v473_v2 = vand.u32 3, %v472_v58  ;;  %v560_v19 = vsel %vm456_vm11, 1.0, %v688_v39  ;;  %v561_v13 = vsel %vm462_vm12, 1.0, %v688_v39 }
  0x58   :  { %358 = vst [vmem:[#allocation7 + $0x4] sm:$0x1] %v356_v43  ;;  %v430_v57 = vmul.f32 1.442695, %v429_v33  ;;  %v433_v1 = vmul.f32 1.442695, %v432_v49 }
  0x59   :  { %375 = vst [vmem:[#allocation7 + $0x5] sm:$0x1] %v373_v47  ;;  %v436_v63 = vmul.f32 1.442695, %v435_v50  ;;  %v439_v18 = vmul.f32 1.442695, %v438_v53 }
  0x5a   :  { %594 = vpow2.f32 %v430_v57  ;;  %v442_v10 = vmul.f32 1.442695, %v441_v55  ;;  %vm474_vm14 = vcmp.eq.s32.totalorder %v473_v2, 0  ;;  %v562_v37 = vsel %vm468_vm13, 1.0, %v688_v39  ;;  %v503_v7 = vld [vmem:[#allocation5 + $0xd] sm:$0x1] }
  0x5b   :  { %596 = vpow2.f32 %v433_v1  ;;  %v563_v27 = vsel %vm474_vm14, 1.0, %v688_v39  ;;  %v514_v39 = vld [vmem:[#allocation5 + $0x8] sm:$0x1] }
  0x5c   :  { %598 = vpow2.f32 %v436_v63 }
  0x5d   :  { %600 = vpow2.f32 %v439_v18 }
  0x5e   :  { %602 = vpow2.f32 %v442_v10 }
  0x60   :  { %v595_v11 = vpop.eup %594 }
  0x61   :  { %v597_v14 = vpop.eup %596  ;;  %v453_v16 = vmul.f32 %v595_v11, %v559_v9 }
  0x62   :  { %v599_v21 = vpop.eup %598  ;;  %v444_v22 = vadd.f32 %v597_v14, %v595_v11  ;;  %v459_v52 = vmul.f32 %v597_v14, %v560_v19 }
  0x63   :  { %v601_v62 = vpop.eup %600  ;;  %v465_v25 = vmul.f32 %v599_v21, %v561_v13  ;;  %v480_v34 = vmul.f32 %v453_v16, %v809_v48  ;;  %v493_v60 = vmul.f32 %v492_v30, %v453_v16  ;;  %v510_v35 = vmul.f32 %v509_v23, %v453_v16 }
  0x64   :  { %v445_v36 = vadd.f32 %v599_v21, %v444_v22  ;;  %v471_v38 = vmul.f32 %v601_v62, %v562_v37  ;;  %v481_v41 = vmul.f32 %v459_v52, %v811_v54  ;;  %v495_v42 = vmul.f32 %v494_v20, %v459_v52  ;;  %v603_v28 = vpop.eup %602 }
  0x65   :  { %v483_v31 = vmul.f32 %v465_v25, %v817_v61  ;;  %v498_v40 = vmul.f32 %v497_v24, %v465_v25  ;;  %v512_v44 = vmul.f32 %v511_v29, %v459_v52  ;;  %v477_v59 = vmul.f32 %v603_v28, %v563_v27 }
  0x66   :  { %v446_v32 = vadd.f32 %v601_v62, %v445_v36  ;;  %v482_v26 = vadd.f32 %v481_v41, %v480_v34  ;;  %v496_v45 = vadd.f32 %v495_v42, %v493_v60  ;;  %v485_v48 = vmul.f32 %v471_v38, %v823_v4 }
  0x67   :  { %v501_v0 = vmul.f32 %v500_v15, %v471_v38  ;;  %v513_v3 = vadd.f32 %v512_v44, %v510_v35  ;;  %v515_v51 = vmul.f32 %v514_v39, %v465_v25  ;;  %v518_v33 = vmul.f32 %v517_v46, %v471_v38 }
  0x68   :  { %v447_v43 = vadd.f32 %v603_v28, %v446_v32  ;;  %v484_v47 = vadd.f32 %v483_v31, %v482_v26  ;;  %v499_v54 = vadd.f32 %v498_v40, %v496_v45  ;;  %v487_v61 = vmul.f32 %v477_v59, %v853_v17 }
  0x69   :  { %v516_v49 = vadd.f32 %v515_v51, %v513_v3  ;;  %v504_v55 = vmul.f32 %v503_v7, %v477_v59  ;;  %v521_v12 = vmul.f32 %v520_v6, %v477_v59 }
  0x6a   :  { %604 = vrcp.f32 %v447_v43  ;;  %v486_v50 = vadd.f32 %v485_v48, %v484_v47  ;;  %v502_v53 = vadd.f32 %v501_v0, %v499_v54 }
  0x6b   :  { %v519_v56 = vadd.f32 %v518_v33, %v516_v49 }
  0x6c   :  { %v488_v58 = vadd.f32 %v487_v61, %v486_v50  ;;  %v505_v4 = vadd.f32 %v504_v55, %v502_v53 }
  0x6d   :  { %v522_v57 = vadd.f32 %v521_v12, %v519_v56 }
  0x70   :  { %v605_v1 = vpop.eup %604 }
  0x71   :  { %v479_v63 = vmul.f32 4.0, %v605_v1 }
  0x73   :  { %v489_v18 = vmul.f32 %v488_v58, %v479_v63  ;;  %v506_v8 = vmul.f32 %v505_v4, %v479_v63  ;;  %v523_v17 = vmul.f32 %v522_v57, %v479_v63 }
  0x75   :  { %491 = vst [vmem:[#allocation7 + $0x6] sm:$0x1] %v489_v18 }
  0x76   :  { %508 = vst [vmem:[#allocation7 + $0x7] sm:$0x1] %v506_v8 }
  0x77   :  { %525 = vst [vmem:[#allocation7 + $0x8] sm:$0x1] %v523_v17 }
  0x78   :  { %538 = dma.vmem_to_hbm [thread:$0]  %s531_s1, 144, %s533_s23, [#allocation4], %s685_s17, %s685_s17, %s686_s18  }
  0x79   :  { %682 = dma.done.wait [#allocation4], 144  }
  0x7a   :  { %683 = vsyncadd [#allocation4], 4294967152 }
  0x7b   :  { %543 = vsyncpa [#allocation3], 1 }
  0x7c   :  { %544 = vsyncpa [#allocation6], 1 }
  0x7d   :  { %545 = vsyncpa [#allocation4], 1 }

</bundles_post_ra>
